<compile_context>
chip_gen: v6e
topology: v6e:2x2x1
jax: 0.10.0
libtpu: 0.0.40
codegen_flags: <defaults>
</compile_context>

<pallas_src>
import functools

import jax
import jax.numpy as jnp
from jax.experimental import pallas as pl
from jax.experimental.pallas import tpu as pltpu

HEAD_PITCH = 128  # lanes per head after zero-padding (lane-tile aligned)


# -----------------------------------------------------------------------------
# In-kernel helpers (traced inside the Pallas kernel)
# -----------------------------------------------------------------------------
def _layernorm(x, gamma, beta, eps=1e-5):
    mean = jnp.mean(x, axis=-1, keepdims=True)
    var = jnp.mean((x - mean) ** 2, axis=-1, keepdims=True)
    return (x - mean) * jax.lax.rsqrt(var + eps) * gamma + beta


def _mha_padded_heads(q_p, k_p, v_p, *, num_heads, head_pitch, d_head):
    """Multi-head attention on head-padded projections (single batch element).

    q_p: [Nq, H*HP] f32, k_p/v_p: [Nk, H*HP] f32.  Only the first `d_head`
    lanes of each head pitch carry data; the remaining lanes are exact zeros
    (guaranteed by prepare_params), so the HP-deep contractions are exact.
    Returns [Nq, H*HP] f32 (padded lanes stay zero).
    """
    bf16 = jnp.bfloat16
    scale = 1.0 / (d_head ** 0.5)
    # Cast once before the head loop (v5e: every cast is f32 VPU work).
    qb = (q_p * scale).astype(bf16)
    kb = k_p.astype(bf16)
    vb = v_p.astype(bf16)
    outs = []
    for h in range(num_heads):            # static unroll; H is small
        lo = h * head_pitch               # 128-lane aligned slice -> no relayout
        qh = qb[:, lo:lo + head_pitch]
        kh = kb[:, lo:lo + head_pitch]
        vh = vb[:, lo:lo + head_pitch]
        # q @ k^T without materializing a transpose (contract last dims).
        s = jax.lax.dot_general(qh, kh, (((1,), (1,)), ((), ())),
                                preferred_element_type=jnp.float32)  # [Nq, Nk]
        s = s - jnp.max(s, axis=-1, keepdims=True)
        p = jnp.exp(s)
        # EUP approximate reciprocal (~1e-3 rel err); every row has >=1 valid
        # key, so the denominator is never 0.  Covered by the 1e-2 tolerance.
        p = p * pl.reciprocal(jnp.sum(p, axis=-1, keepdims=True), approx=True)
        outs.append(jnp.dot(p.astype(bf16), vh,
                            preferred_element_type=jnp.float32))
    # Concatenation at 128-lane boundaries (no masked stores / relayout).
    return jnp.concatenate(outs, axis=-1)  # [Nq, H*HP] f32


# -----------------------------------------------------------------------------
# Fused decoder-layer kernel (one (batch, query-row-tile) grid step)
# -----------------------------------------------------------------------------
def decoder_layer_kernel(
        qt_ref, qpt_ref, qf_ref, qpf_ref, kf_ref, kpf_ref, vf_ref,
        sa_wq_ref, sa_bq_ref, sa_wk_ref, sa_bk_ref, sa_wv_ref, sa_bv_ref,
        sa_wo_ref, sa_bo_ref,
        n0_g_ref, n0_b_ref,
        ca_wq_ref, ca_bq_ref, ca_wk_ref, ca_bk_ref, ca_wv_ref, ca_bv_ref,
        ca_wo_ref, ca_bo_ref,
        n1_g_ref, n1_b_ref,
        f_w1_ref, f_b1_ref, f_w2_ref, f_b2_ref,
        n2_g_ref, n2_b_ref,
        o_ref, *, num_heads, head_pitch, d_head):
    bf16 = jnp.bfloat16
    f32 = jnp.float32

    x = qt_ref[...]          # [T, D]   query row tile of this batch
    qpos_t = qpt_ref[...]    # [T, D]
    q_full = qf_ref[...]     # [Lq, D]  this batch's full query (self-attn K/V)
    qpos_f = qpf_ref[...]    # [Lq, D]
    key = kf_ref[...]        # [Lk, D]
    kpos = kpf_ref[...]      # [Lk, D]
    value = vf_ref[...]      # [Lk, D]

    # ---- self_attn: Q from the tile, K/V from the full per-batch query ----
    q_p = jnp.dot((x + qpos_t).astype(bf16), sa_wq_ref[...],
                  preferred_element_type=f32) + sa_bq_ref[...]
    k_p = jnp.dot((q_full + qpos_f).astype(bf16), sa_wk_ref[...],
                  preferred_element_type=f32) + sa_bk_ref[...]
    v_p = jnp.dot(q_full.astype(bf16), sa_wv_ref[...],
                  preferred_element_type=f32) + sa_bv_ref[...]
    attn = _mha_padded_heads(q_p, k_p, v_p, num_heads=num_heads,
                             head_pitch=head_pitch, d_head=d_head)
    x = x + (jnp.dot(attn.astype(bf16), sa_wo_ref[...],
                     preferred_element_type=f32) + sa_bo_ref[...])
    x = _layernorm(x, n0_g_ref[...], n0_b_ref[...])

    # ---- cross_attn ----
    q_p = jnp.dot((x + qpos_t).astype(bf16), ca_wq_ref[...],
                  preferred_element_type=f32) + ca_bq_ref[...]
    k_p = jnp.dot((key + kpos).astype(bf16), ca_wk_ref[...],
                  preferred_element_type=f32) + ca_bk_ref[...]
    v_p = jnp.dot(value.astype(bf16), ca_wv_ref[...],
                  preferred_element_type=f32) + ca_bv_ref[...]
    attn = _mha_padded_heads(q_p, k_p, v_p, num_heads=num_heads,
                             head_pitch=head_pitch, d_head=d_head)
    x = x + (jnp.dot(attn.astype(bf16), ca_wo_ref[...],
                     preferred_element_type=f32) + ca_bo_ref[...])
    x = _layernorm(x, n1_g_ref[...], n1_b_ref[...])

    # ---- FFN: Linear -> ReLU -> Linear, residual from in-VMEM activation ----
    h = jnp.dot(x.astype(bf16), f_w1_ref[...],
                preferred_element_type=f32) + f_b1_ref[...]
    h = jnp.maximum(h, 0.0)
    y = jnp.dot(h.astype(bf16), f_w2_ref[...],
                preferred_element_type=f32) + f_b2_ref[...]
    x = _layernorm(x + y, n2_g_ref[...], n2_b_ref[...])

    o_ref[...] = x


# -----------------------------------------------------------------------------
# Parameter packing (head-padded, bf16 matmul weights)
# -----------------------------------------------------------------------------
_PARAM_ORDER = (
    'sa_wq', 'sa_bq', 'sa_wk', 'sa_bk', 'sa_wv', 'sa_bv', 'sa_wo', 'sa_bo',
    'n0_g', 'n0_b',
    'ca_wq', 'ca_bq', 'ca_wk', 'ca_bk', 'ca_wv', 'ca_bv', 'ca_wo', 'ca_bo',
    'n1_g', 'n1_b',
    'f_w1', 'f_b1', 'f_w2', 'f_b2',
    'n2_g', 'n2_b',
)


def _pad_in_proj(w, b, num_heads, d_head, head_pitch, wdtype):
    """[D, H*dh] / [1, H*dh] -> head-padded [D, H*HP] / [1, H*HP].
    Padded lanes are exact zeros (weights AND bias), so QK^T / P@V are exact."""
    d_in = w.shape[0]
    wp = jnp.zeros((d_in, num_heads, head_pitch), jnp.float32)
    wp = wp.at[:, :, :d_head].set(w.reshape(d_in, num_heads, d_head))
    bp = jnp.zeros((1, num_heads, head_pitch), jnp.float32)
    bp = bp.at[:, :, :d_head].set(b.reshape(1, num_heads, d_head))
    return (wp.reshape(d_in, num_heads * head_pitch).astype(wdtype),
            bp.reshape(1, num_heads * head_pitch))


def _pad_out_proj(w, num_heads, d_head, head_pitch, wdtype):
    """[H*dh, D] -> [H*HP, D] with zero rows at the padded head lanes."""
    d_out = w.shape[1]
    wp = jnp.zeros((num_heads, head_pitch, d_out), jnp.float32)
    wp = wp.at[:, :d_head, :].set(w.reshape(num_heads, d_head, d_out))
    return wp.reshape(num_heads * head_pitch, d_out).astype(wdtype)


def prepare_params(params, num_heads, head_pitch):
    """One-time packing/casting of the module parameters for the fused kernel.

    Matmul weights -> bf16 (MXU native); biases and LayerNorm affine params
    stay f32.  Attention projections are zero-padded per head to a 128-lane
    pitch so every in-kernel head slice is lane-tile aligned."""
    sa, ca, ffn = params['self_attn'], params['cross_attn'], params['ffn']
    D = sa['wq'].shape[0]
    d_head = D // num_heads
    bf16 = jnp.bfloat16

    sa_wq, sa_bq = _pad_in_proj(sa['wq'], sa['bq'], num_heads, d_head, head_pitch, bf16)
    sa_wk, sa_bk = _pad_in_proj(sa['wk'], sa['bk'], num_heads, d_head, head_pitch, bf16)
    sa_wv, sa_bv = _pad_in_proj(sa['wv'], sa['bv'], num_heads, d_head, head_pitch, bf16)
    ca_wq, ca_bq = _pad_in_proj(ca['wq'], ca['bq'], num_heads, d_head, head_pitch, bf16)
    ca_wk, ca_bk = _pad_in_proj(ca['wk'], ca['bk'], num_heads, d_head, head_pitch, bf16)
    ca_wv, ca_bv = _pad_in_proj(ca['wv'], ca['bv'], num_heads, d_head, head_pitch, bf16)

    p = dict(
        sa_wq=sa_wq, sa_bq=sa_bq, sa_wk=sa_wk, sa_bk=sa_bk,
        sa_wv=sa_wv, sa_bv=sa_bv,
        sa_wo=_pad_out_proj(sa['wo'], num_heads, d_head, head_pitch, bf16),
        sa_bo=sa['bo'],
        n0_g=params['norm0']['gamma'], n0_b=params['norm0']['beta'],
        ca_wq=ca_wq, ca_bq=ca_bq, ca_wk=ca_wk, ca_bk=ca_bk,
        ca_wv=ca_wv, ca_bv=ca_bv,
        ca_wo=_pad_out_proj(ca['wo'], num_heads, d_head, head_pitch, bf16),
        ca_bo=ca['bo'],
        n1_g=params['norm1']['gamma'], n1_b=params['norm1']['beta'],
        f_w1=ffn['w1'].astype(bf16), f_b1=ffn['b1'],
        f_w2=ffn['w2'].astype(bf16), f_b2=ffn['b2'],
        n2_g=params['norm2']['gamma'], n2_b=params['norm2']['beta'],
    )
    return [p[name] for name in _PARAM_ORDER]


def _pick_row_tile(lq, max_rows=512):
    """Largest divisor of lq <= max_rows, preferring multiples of 8."""
    if lq <= max_rows:
        return lq
    best = None
    for t in range(max_rows, 0, -1):
        if lq % t == 0:
            if t % 8 == 0:
                return t
            if best is None:
                best = t
    return best if best is not None else lq


# -----------------------------------------------------------------------------
# Wrapper: gridded pallas_call
# -----------------------------------------------------------------------------
def transformer_decoder_layer(query, key, value, query_pos, key_pos, params,
                              num_heads, *, head_pitch=HEAD_PITCH,
                              row_tile=None):
    """operation_order = (self_attn, norm, cross_attn, norm, ffn, norm).

    query/query_pos: [Lq, B, D]; key/value/key_pos: [Lk, B, D]
    (batch_first=False).  Returns [Lq, B, D] float32.
    """
    Lq, B, D = query.shape
    Lk = key.shape[0]
    d_head = D // num_heads
    F = params['ffn']['w1'].shape[1]
    hp_tot = num_heads * head_pitch

    # One cheap XLA transpose so rows are batch-blocked (no masks in-kernel).
    qb = jnp.transpose(query, (1, 0, 2))       # [B, Lq, D]
    qpb = jnp.transpose(query_pos, (1, 0, 2))  # [B, Lq, D]
    kb = jnp.transpose(key, (1, 0, 2))         # [B, Lk, D]
    kpb = jnp.transpose(key_pos, (1, 0, 2))    # [B, Lk, D]
    vb = jnp.transpose(value, (1, 0, 2))       # [B, Lk, D]

    if row_tile is None:
        row_tile = _pick_row_tile(Lq)
    assert Lq % row_tile == 0, "row tile must divide the query length"
    n_tiles = Lq // row_tile
    grid = (B, n_tiles)

    flat_params = prepare_params(params, num_heads, head_pitch)

    # Row-tiled query blocks (pipelined); per-batch full blocks for K/V
    # sources; full-extent constant blocks for weights (fetched once).
    tile_spec = pl.BlockSpec((None, row_tile, D), lambda b, i: (b, i, 0))
    q_full_spec = pl.BlockSpec((None, Lq, D), lambda b, i: (b, 0, 0))
    kv_full_spec = pl.BlockSpec((None, Lk, D), lambda b, i: (b, 0, 0))

    def full_spec(arr):
        zeros = (0,) * arr.ndim
        return pl.BlockSpec(arr.shape, lambda b, i: zeros)

    in_specs = ([tile_spec, tile_spec, q_full_spec, q_full_spec,
                 kv_full_spec, kv_full_spec, kv_full_spec]
                + [full_spec(p) for p in flat_params])
    out_specs = pl.BlockSpec((None, row_tile, D), lambda b, i: (b, i, 0))

    # Advisory cost estimate (padded head widths = actual MXU work issued).
    flops = int(
        2 * B * Lq * D * hp_tot                    # self Q proj
        + 2 * 2 * B * n_tiles * Lq * D * hp_tot    # self K/V proj (per tile)
        + 2 * 2 * B * Lq * Lq * hp_tot             # self QK^T + P@V
        + 2 * B * Lq * hp_tot * D                  # self out proj
        + 2 * B * Lq * D * hp_tot                  # cross Q proj
        + 2 * 2 * B * n_tiles * Lk * D * hp_tot    # cross K/V proj (per tile)
        + 2 * 2 * B * Lq * Lk * hp_tot             # cross QK^T + P@V
        + 2 * B * Lq * hp_tot * D                  # cross out proj
        + 2 * 2 * B * Lq * D * F)                  # FFN
    transcendentals = int(B * Lq * (Lq + Lk) * num_heads)
    weight_bytes = sum(int(p.size) * p.dtype.itemsize for p in flat_params)
    act_bytes = 4 * int(qb.size + qpb.size + kb.size + kpb.size + vb.size
                        + B * Lq * D)
    cost = pl.CostEstimate(flops=flops, transcendentals=transcendentals,
                           bytes_accessed=act_bytes + weight_bytes)

    out = pl.pallas_call(
        functools.partial(decoder_layer_kernel, num_heads=num_heads,
                          head_pitch=head_pitch, d_head=d_head),
        out_shape=jax.ShapeDtypeStruct((B, Lq, D), jnp.float32),
        grid=grid,
        in_specs=in_specs,
        out_specs=out_specs,
        compiler_params=pltpu.CompilerParams(
            # batch and row-tile axes are independent -> megacore-shardable.
            dimension_semantics=("parallel", "parallel"),
            # v7x has 64 MiB physical / 32 MiB default-scoped VMEM; 32 MiB is
            # a safe explicit cap on every generation at these tile sizes.
            vmem_limit_bytes=32 * 1024 * 1024),
        cost_estimate=cost,
    )(qb, qpb, qb, qpb, kb, kpb, vb, *flat_params)

    return jnp.transpose(out, (1, 0, 2))  # back to [Lq, B, D]


# -----------------------------------------------------------------------------
# Pure-JAX references
# -----------------------------------------------------------------------------
def _ref_layer_f32(query, key, value, qp, kp, params, num_heads):
    """Full-f32 semantic reference (mirrors the PyTorch module)."""
    def mha(q_src, k_src, v_src, qpos, kpos, p):
        lq, b, d = q_src.shape
        lk = k_src.shape[0]
        dh = d // num_heads
        q = (q_src + qpos) @ p['wq'] + p['bq']
        k = (k_src + kpos) @ p['wk'] + p['bk']
        v = v_src @ p['wv'] + p['bv']
        qh = q.reshape(lq, b, num_heads, dh)
        kh = k.reshape(lk, b, num_heads, dh)
        vh = v.reshape(lk, b, num_heads, dh)
        s = jnp.einsum('qbhd,kbhd->bhqk', qh, kh) / jnp.sqrt(dh)
        pr = jax.nn.softmax(s, axis=-1)
        o = jnp.einsum('bhqk,kbhd->qbhd', pr, vh).reshape(lq, b, d)
        return q_src + (o @ p['wo'] + p['bo'])

    def ln(x, p):
        mean = jnp.mean(x, axis=-1, keepdims=True)
        var = jnp.mean((x - mean) ** 2, axis=-1, keepdims=True)
        return (x - mean) / jnp.sqrt(var + 1e-5) * p['gamma'] + p['beta']

    def ffn(x, p):
        h = jnp.maximum(x @ p['w1'] + p['b1'], 0.0)
        return x + (h @ p['w2'] + p['b2'])

    x = mha(query, query, query, qp, qp, params['self_attn'])
    x = ln(x, params['norm0'])
    x = mha(x, key, value, qp, kp, params['cross_attn'])
    x = ln(x, params['norm1'])
    x = ffn(x, params['ffn'])
    x = ln(x, params['norm2'])
    return x


def _ref_layer_bf16(query, key, value, qp, kp, params, num_heads):
    """Reference mirroring the kernel's mixed precision (bf16 matmul operands,
    f32 accumulation, f32 softmax/LayerNorm) for a tight numerical check."""
    bf16 = jnp.bfloat16
    f32 = jnp.float32

    def mha(q_src, k_src, v_src, qpos, kpos, p):
        lq, b, d = q_src.shape
        lk = k_src.shape[0]
        dh = d // num_heads
        scale = 1.0 / (dh ** 0.5)
        q = jnp.matmul((q_src + qpos).astype(bf16), p['wq'].astype(bf16),
                       preferred_element_type=f32) + p['bq']
        k = jnp.matmul((k_src + kpos).astype(bf16), p['wk'].astype(bf16),
                       preferred_element_type=f32) + p['bk']
        v = jnp.matmul(v_src.astype(bf16), p['wv'].astype(bf16),
                       preferred_element_type=f32) + p['bv']
        qh = (q * scale).astype(bf16).reshape(lq, b, num_heads, dh)
        kh = k.astype(bf16).reshape(lk, b, num_heads, dh)
        vh = v.astype(bf16).reshape(lk, b, num_heads, dh)
        s = jnp.einsum('qbhd,kbhd->bhqk', qh, kh, preferred_element_type=f32)
        s = s - jnp.max(s, axis=-1, keepdims=True)
        e = jnp.exp(s)
        pr = e / jnp.sum(e, axis=-1, keepdims=True)
        o = jnp.einsum('bhqk,kbhd->qbhd', pr.astype(bf16), vh,
                       preferred_element_type=f32).reshape(lq, b, d)
        out = jnp.matmul(o.astype(bf16), p['wo'].astype(bf16),
                         preferred_element_type=f32) + p['bo']
        return q_src + out

    def ln(x, p):
        mean = jnp.mean(x, axis=-1, keepdims=True)
        var = jnp.mean((x - mean) ** 2, axis=-1, keepdims=True)
        return (x - mean) * jax.lax.rsqrt(var + 1e-5) * p['gamma'] + p['beta']

    def ffn(x, p):
        h = jnp.matmul(x.astype(bf16), p['w1'].astype(bf16),
                       preferred_element_type=f32) + p['b1']
        h = jnp.maximum(h, 0.0)
        y = jnp.matmul(h.astype(bf16), p['w2'].astype(bf16),
                       preferred_element_type=f32) + p['b2']
        return x + y

    x = mha(query, query, query, qp, qp, params['self_attn'])
    x = ln(x, params['norm0'])
    x = mha(x, key, value, qp, kp, params['cross_attn'])
    x = ln(x, params['norm1'])
    x = ffn(x, params['ffn'])
    x = ln(x, params['norm2'])
    return x


# -----------------------------------------------------------------------------
# Deterministic parameter init
# -----------------------------------------------------------------------------
def init_attn_params(key, D):
    ks = jax.random.split(key, 8)
    s = 0.1
    return dict(
        wq=jax.random.normal(ks[0], (D, D), jnp.float32) * s,
        bq=jax.random.normal(ks[1], (1, D), jnp.float32) * s,
        wk=jax.random.normal(ks[2], (D, D), jnp.float32) * s,
        bk=jax.random.normal(ks[3], (1, D), jnp.float32) * s,
        wv=jax.random.normal(ks[4], (D, D), jnp.float32) * s,
        bv=jax.random.normal(ks[5], (1, D), jnp.float32) * s,
        wo=jax.random.normal(ks[6], (D, D), jnp.float32) * s,
        bo=jax.random.normal(ks[7], (1, D), jnp.float32) * s,
    )


def init_ln_params(key, D):
    ks = jax.random.split(key, 2)
    return dict(
        gamma=1.0 + 0.05 * jax.random.normal(ks[0], (1, D), jnp.float32),
        beta=0.05 * jax.random.normal(ks[1], (1, D), jnp.float32),
    )


def init_ffn_params(key, D, F):
    ks = jax.random.split(key, 4)
    s = 0.1
    return dict(
        w1=jax.random.normal(ks[0], (D, F), jnp.float32) * s,
        b1=jax.random.normal(ks[1], (1, F), jnp.float32) * s,
        w2=jax.random.normal(ks[2], (F, D), jnp.float32) * s,
        b2=jax.random.normal(ks[3], (1, D), jnp.float32) * s,
    )


# -----------------------------------------------------------------------------
if __name__ == "__main__":
    Lq, Lk, B, D, H, F = 8, 16, 2, 32, 4, 64

    root = jax.random.PRNGKey(0)
    k_in, k_sa, k_ca, k_n0, k_n1, k_n2, k_ffn = jax.random.split(root, 7)

    params = dict(
        self_attn=init_attn_params(k_sa, D),
        cross_attn=init_attn_params(k_ca, D),
        norm0=init_ln_params(k_n0, D),
        norm1=init_ln_params(k_n1, D),
        norm2=init_ln_params(k_n2, D),
        ffn=init_ffn_params(k_ffn, D, F),
    )

    ki = jax.random.split(k_in, 5)
    query = jax.random.normal(ki[0], (Lq, B, D), jnp.float32)
    key_t = jax.random.normal(ki[1], (Lk, B, D), jnp.float32)
    value = jax.random.normal(ki[2], (Lk, B, D), jnp.float32)
    query_pos = jax.random.normal(ki[3], (Lq, B, D), jnp.float32)
    key_pos = jax.random.normal(ki[4], (Lk, B, D), jnp.float32)

    out = transformer_decoder_layer(query, key_t, value, query_pos, key_pos,
                                    params, H)
    out = jax.block_until_ready(out)
    assert out.shape == (Lq, B, D)

    # Tight check vs a reference matching the kernel's bf16 matmul precision.
    ref_bf16 = _ref_layer_bf16(query, key_t, value, query_pos, key_pos,
                               params, H)
    assert jnp.allclose(out, ref_bf16, atol=1e-2, rtol=1e-2), \
        "mismatch vs bf16-matched reference"

    # Looser semantic check vs the full-f32 reference of the PyTorch module.
    ref_f32 = _ref_layer_f32(query, key_t, value, query_pos, key_pos,
                             params, H)
    assert jnp.allclose(out, ref_f32, atol=5e-2, rtol=5e-2), \
        "mismatch vs f32 reference"

    print("KERNEL_OK")
</pallas_src>

<mosaic_0001>
module attributes {stable_mosaic.version = 11 : i64} {
  func.func @decoder_layer_kernel(%arg0: i32, %arg1: i32, %arg2: memref<1x8x32xf32, #tpu.memory_space<vmem>>, %arg3: memref<1x8x32xf32, #tpu.memory_space<vmem>>, %arg4: memref<1x8x32xf32, #tpu.memory_space<vmem>>, %arg5: memref<1x8x32xf32, #tpu.memory_space<vmem>>, %arg6: memref<1x16x32xf32, #tpu.memory_space<vmem>>, %arg7: memref<1x16x32xf32, #tpu.memory_space<vmem>>, %arg8: memref<1x16x32xf32, #tpu.memory_space<vmem>>, %arg9: memref<32x512xbf16, #tpu.memory_space<vmem>>, %arg10: memref<1x512xf32, #tpu.memory_space<vmem>>, %arg11: memref<32x512xbf16, #tpu.memory_space<vmem>>, %arg12: memref<1x512xf32, #tpu.memory_space<vmem>>, %arg13: memref<32x512xbf16, #tpu.memory_space<vmem>>, %arg14: memref<1x512xf32, #tpu.memory_space<vmem>>, %arg15: memref<512x32xbf16, #tpu.memory_space<vmem>>, %arg16: memref<1x32xf32, #tpu.memory_space<vmem>>, %arg17: memref<1x32xf32, #tpu.memory_space<vmem>>, %arg18: memref<1x32xf32, #tpu.memory_space<vmem>>, %arg19: memref<32x512xbf16, #tpu.memory_space<vmem>>, %arg20: memref<1x512xf32, #tpu.memory_space<vmem>>, %arg21: memref<32x512xbf16, #tpu.memory_space<vmem>>, %arg22: memref<1x512xf32, #tpu.memory_space<vmem>>, %arg23: memref<32x512xbf16, #tpu.memory_space<vmem>>, %arg24: memref<1x512xf32, #tpu.memory_space<vmem>>, %arg25: memref<512x32xbf16, #tpu.memory_space<vmem>>, %arg26: memref<1x32xf32, #tpu.memory_space<vmem>>, %arg27: memref<1x32xf32, #tpu.memory_space<vmem>>, %arg28: memref<1x32xf32, #tpu.memory_space<vmem>>, %arg29: memref<32x64xbf16, #tpu.memory_space<vmem>>, %arg30: memref<1x64xf32, #tpu.memory_space<vmem>>, %arg31: memref<64x32xbf16, #tpu.memory_space<vmem>>, %arg32: memref<1x32xf32, #tpu.memory_space<vmem>>, %arg33: memref<1x32xf32, #tpu.memory_space<vmem>>, %arg34: memref<1x32xf32, #tpu.memory_space<vmem>>, %arg35: memref<1x8x32xf32, #tpu.memory_space<vmem>>) attributes {dimension_semantics = [#tpu.dimension_semantics<parallel>, #tpu.dimension_semantics<parallel>], iteration_bounds = array<i64: 2, 1>, scalar_prefetch = 0 : i64, scratch_operands = 0 : i64, tpu.core_type = #tpu.core_type<tc>, window_params = [{transform_indices = @transform_0, window_bounds = array<i64: 1, 8, 32>}, {transform_indices = @transform_1, window_bounds = array<i64: 1, 8, 32>}, {transform_indices = @transform_2, window_bounds = array<i64: 1, 8, 32>}, {transform_indices = @transform_3, window_bounds = array<i64: 1, 8, 32>}, {transform_indices = @transform_4, window_bounds = array<i64: 1, 16, 32>}, {transform_indices = @transform_5, window_bounds = array<i64: 1, 16, 32>}, {transform_indices = @transform_6, window_bounds = array<i64: 1, 16, 32>}, {pipeline_mode = #tpu.pipeline_mode<synchronous>, transform_indices = @transform_7, window_bounds = array<i64: 32, 512>}, {pipeline_mode = #tpu.pipeline_mode<synchronous>, transform_indices = @transform_8, window_bounds = array<i64: 1, 512>}, {pipeline_mode = #tpu.pipeline_mode<synchronous>, transform_indices = @transform_9, window_bounds = array<i64: 32, 512>}, {pipeline_mode = #tpu.pipeline_mode<synchronous>, transform_indices = @transform_10, window_bounds = array<i64: 1, 512>}, {pipeline_mode = #tpu.pipeline_mode<synchronous>, transform_indices = @transform_11, window_bounds = array<i64: 32, 512>}, {pipeline_mode = #tpu.pipeline_mode<synchronous>, transform_indices = @transform_12, window_bounds = array<i64: 1, 512>}, {pipeline_mode = #tpu.pipeline_mode<synchronous>, transform_indices = @transform_13, window_bounds = array<i64: 512, 32>}, {pipeline_mode = #tpu.pipeline_mode<synchronous>, transform_indices = @transform_14, window_bounds = array<i64: 1, 32>}, {pipeline_mode = #tpu.pipeline_mode<synchronous>, transform_indices = @transform_15, window_bounds = array<i64: 1, 32>}, {pipeline_mode = #tpu.pipeline_mode<synchronous>, transform_indices = @transform_16, window_bounds = array<i64: 1, 32>}, {pipeline_mode = #tpu.pipeline_mode<synchronous>, transform_indices = @transform_17, window_bounds = array<i64: 32, 512>}, {pipeline_mode = #tpu.pipeline_mode<synchronous>, transform_indices = @transform_18, window_bounds = array<i64: 1, 512>}, {pipeline_mode = #tpu.pipeline_mode<synchronous>, transform_indices = @transform_19, window_bounds = array<i64: 32, 512>}, {pipeline_mode = #tpu.pipeline_mode<synchronous>, transform_indices = @transform_20, window_bounds = array<i64: 1, 512>}, {pipeline_mode = #tpu.pipeline_mode<synchronous>, transform_indices = @transform_21, window_bounds = array<i64: 32, 512>}, {pipeline_mode = #tpu.pipeline_mode<synchronous>, transform_indices = @transform_22, window_bounds = array<i64: 1, 512>}, {pipeline_mode = #tpu.pipeline_mode<synchronous>, transform_indices = @transform_23, window_bounds = array<i64: 512, 32>}, {pipeline_mode = #tpu.pipeline_mode<synchronous>, transform_indices = @transform_24, window_bounds = array<i64: 1, 32>}, {pipeline_mode = #tpu.pipeline_mode<synchronous>, transform_indices = @transform_25, window_bounds = array<i64: 1, 32>}, {pipeline_mode = #tpu.pipeline_mode<synchronous>, transform_indices = @transform_26, window_bounds = array<i64: 1, 32>}, {pipeline_mode = #tpu.pipeline_mode<synchronous>, transform_indices = @transform_27, window_bounds = array<i64: 32, 64>}, {pipeline_mode = #tpu.pipeline_mode<synchronous>, transform_indices = @transform_28, window_bounds = array<i64: 1, 64>}, {pipeline_mode = #tpu.pipeline_mode<synchronous>, transform_indices = @transform_29, window_bounds = array<i64: 64, 32>}, {pipeline_mode = #tpu.pipeline_mode<synchronous>, transform_indices = @transform_30, window_bounds = array<i64: 1, 32>}, {pipeline_mode = #tpu.pipeline_mode<synchronous>, transform_indices = @transform_31, window_bounds = array<i64: 1, 32>}, {pipeline_mode = #tpu.pipeline_mode<synchronous>, transform_indices = @transform_32, window_bounds = array<i64: 1, 32>}, {transform_indices = @transform_33, window_bounds = array<i64: 1, 8, 32>}]} {
    %c0 = arith.constant 0 : index
    %c0_0 = arith.constant 0 : index
    %c0_1 = arith.constant 0 : index
    %0 = vector.load %arg2[%c0, %c0_0, %c0_1] : memref<1x8x32xf32, #tpu.memory_space<vmem>>, vector<1x8x32xf32>
    %1 = vector.shape_cast %0 : vector<1x8x32xf32> to vector<8x32xf32>
    %c0_2 = arith.constant 0 : index
    %c0_3 = arith.constant 0 : index
    %c0_4 = arith.constant 0 : index
    %2 = vector.load %arg3[%c0_2, %c0_3, %c0_4] : memref<1x8x32xf32, #tpu.memory_space<vmem>>, vector<1x8x32xf32>
    %3 = vector.shape_cast %2 : vector<1x8x32xf32> to vector<8x32xf32>
    %c0_5 = arith.constant 0 : index
    %c0_6 = arith.constant 0 : index
    %c0_7 = arith.constant 0 : index
    %4 = vector.load %arg4[%c0_5, %c0_6, %c0_7] : memref<1x8x32xf32, #tpu.memory_space<vmem>>, vector<1x8x32xf32>
    %5 = vector.shape_cast %4 : vector<1x8x32xf32> to vector<8x32xf32>
    %c0_8 = arith.constant 0 : index
    %c0_9 = arith.constant 0 : index
    %c0_10 = arith.constant 0 : index
    %6 = vector.load %arg5[%c0_8, %c0_9, %c0_10] : memref<1x8x32xf32, #tpu.memory_space<vmem>>, vector<1x8x32xf32>
    %7 = vector.shape_cast %6 : vector<1x8x32xf32> to vector<8x32xf32>
    %c0_11 = arith.constant 0 : index
    %c0_12 = arith.constant 0 : index
    %c0_13 = arith.constant 0 : index
    %8 = vector.load %arg6[%c0_11, %c0_12, %c0_13] : memref<1x16x32xf32, #tpu.memory_space<vmem>>, vector<1x16x32xf32>
    %9 = vector.shape_cast %8 : vector<1x16x32xf32> to vector<16x32xf32>
    %c0_14 = arith.constant 0 : index
    %c0_15 = arith.constant 0 : index
    %c0_16 = arith.constant 0 : index
    %10 = vector.load %arg7[%c0_14, %c0_15, %c0_16] : memref<1x16x32xf32, #tpu.memory_space<vmem>>, vector<1x16x32xf32>
    %11 = vector.shape_cast %10 : vector<1x16x32xf32> to vector<16x32xf32>
    %c0_17 = arith.constant 0 : index
    %c0_18 = arith.constant 0 : index
    %c0_19 = arith.constant 0 : index
    %12 = vector.load %arg8[%c0_17, %c0_18, %c0_19] : memref<1x16x32xf32, #tpu.memory_space<vmem>>, vector<1x16x32xf32>
    %13 = vector.shape_cast %12 : vector<1x16x32xf32> to vector<16x32xf32>
    %14 = arith.addf %1, %3 : vector<8x32xf32>
    %15 = arith.truncf %14 : vector<8x32xf32> to vector<8x32xbf16>
    %c0_20 = arith.constant 0 : index
    %c0_21 = arith.constant 0 : index
    %16 = vector.load %arg9[%c0_20, %c0_21] : memref<32x512xbf16, #tpu.memory_space<vmem>>, vector<32x512xbf16>
    %cst = arith.constant dense<0.000000e+00> : vector<8x512xf32>
    %17 = tpu.matmul %15, %16, %cst {dimension_numbers = #tpu.dot_dimension_numbers<[1], [0], [0], [1], [0, 0, 1, 1], [], []>} : vector<8x32xbf16>, vector<32x512xbf16>, vector<8x512xf32> -> vector<8x512xf32>
    %c0_22 = arith.constant 0 : index
    %c0_23 = arith.constant 0 : index
    %18 = vector.load %arg10[%c0_22, %c0_23] : memref<1x512xf32, #tpu.memory_space<vmem>>, vector<1x512xf32>
    %19 = vector.broadcast %18 : vector<1x512xf32> to vector<8x512xf32>
    %20 = arith.addf %17, %19 : vector<8x512xf32>
    %21 = arith.addf %5, %7 : vector<8x32xf32>
    %22 = arith.truncf %21 : vector<8x32xf32> to vector<8x32xbf16>
    %c0_24 = arith.constant 0 : index
    %c0_25 = arith.constant 0 : index
    %23 = vector.load %arg11[%c0_24, %c0_25] : memref<32x512xbf16, #tpu.memory_space<vmem>>, vector<32x512xbf16>
    %cst_26 = arith.constant dense<0.000000e+00> : vector<8x512xf32>
    %24 = tpu.matmul %22, %23, %cst_26 {dimension_numbers = #tpu.dot_dimension_numbers<[1], [0], [0], [1], [0, 0, 1, 1], [], []>} : vector<8x32xbf16>, vector<32x512xbf16>, vector<8x512xf32> -> vector<8x512xf32>
    %c0_27 = arith.constant 0 : index
    %c0_28 = arith.constant 0 : index
    %25 = vector.load %arg12[%c0_27, %c0_28] : memref<1x512xf32, #tpu.memory_space<vmem>>, vector<1x512xf32>
    %26 = vector.broadcast %25 : vector<1x512xf32> to vector<8x512xf32>
    %27 = arith.addf %24, %26 : vector<8x512xf32>
    %28 = arith.truncf %5 : vector<8x32xf32> to vector<8x32xbf16>
    %c0_29 = arith.constant 0 : index
    %c0_30 = arith.constant 0 : index
    %29 = vector.load %arg13[%c0_29, %c0_30] : memref<32x512xbf16, #tpu.memory_space<vmem>>, vector<32x512xbf16>
    %cst_31 = arith.constant dense<0.000000e+00> : vector<8x512xf32>
    %30 = tpu.matmul %28, %29, %cst_31 {dimension_numbers = #tpu.dot_dimension_numbers<[1], [0], [0], [1], [0, 0, 1, 1], [], []>} : vector<8x32xbf16>, vector<32x512xbf16>, vector<8x512xf32> -> vector<8x512xf32>
    %c0_32 = arith.constant 0 : index
    %c0_33 = arith.constant 0 : index
    %31 = vector.load %arg14[%c0_32, %c0_33] : memref<1x512xf32, #tpu.memory_space<vmem>>, vector<1x512xf32>
    %32 = vector.broadcast %31 : vector<1x512xf32> to vector<8x512xf32>
    %33 = arith.addf %30, %32 : vector<8x512xf32>
    %cst_34 = arith.constant 0.353553385 : f32
    %34 = vector.broadcast %cst_34 : f32 to vector<8x512xf32>
    %35 = arith.mulf %20, %34 : vector<8x512xf32>
    %36 = arith.truncf %35 : vector<8x512xf32> to vector<8x512xbf16>
    %37 = arith.truncf %27 : vector<8x512xf32> to vector<8x512xbf16>
    %38 = arith.truncf %33 : vector<8x512xf32> to vector<8x512xbf16>
    %39 = vector.extract_strided_slice %36 {offsets = [0, 0], sizes = [8, 128], strides = [1, 1]} : vector<8x512xbf16> to vector<8x128xbf16>
    %40 = vector.extract_strided_slice %37 {offsets = [0, 0], sizes = [8, 128], strides = [1, 1]} : vector<8x512xbf16> to vector<8x128xbf16>
    %41 = vector.extract_strided_slice %38 {offsets = [0, 0], sizes = [8, 128], strides = [1, 1]} : vector<8x512xbf16> to vector<8x128xbf16>
    %cst_35 = arith.constant dense<0.000000e+00> : vector<8x8xf32>
    %42 = tpu.matmul %39, %40, %cst_35 {dimension_numbers = #tpu.dot_dimension_numbers<[1], [1], [0], [0], [0, 0, 1, 0], [], []>} : vector<8x128xbf16>, vector<8x128xbf16>, vector<8x8xf32> -> vector<8x8xf32>
    %cst_36 = arith.constant dense<0xFF800000> : vector<8xf32>
    %43 = vector.multi_reduction <maximumf>, %42, %cst_36 [1] : vector<8x8xf32> to vector<8xf32>
    %44 = vector.shape_cast %43 : vector<8xf32> to vector<8x1xf32>
    %45 = vector.broadcast %44 : vector<8x1xf32> to vector<8x8xf32>
    %46 = arith.subf %42, %45 : vector<8x8xf32>
    %47 = math.exp %46 : vector<8x8xf32>
    %cst_37 = arith.constant dense<0.000000e+00> : vector<8xf32>
    %48 = vector.multi_reduction <add>, %47, %cst_37 [1] : vector<8x8xf32> to vector<8xf32>
    %49 = vector.shape_cast %48 : vector<8xf32> to vector<8x1xf32>
    %50 = tpu.reciprocal %49 {approx = true} : vector<8x1xf32> -> vector<8x1xf32>
    %51 = vector.broadcast %50 : vector<8x1xf32> to vector<8x8xf32>
    %52 = arith.mulf %47, %51 : vector<8x8xf32>
    %53 = arith.truncf %52 : vector<8x8xf32> to vector<8x8xbf16>
    %cst_38 = arith.constant dense<0.000000e+00> : vector<8x128xf32>
    %54 = tpu.matmul %53, %41, %cst_38 {dimension_numbers = #tpu.dot_dimension_numbers<[1], [0], [0], [1], [0, 0, 1, 1], [], []>} : vector<8x8xbf16>, vector<8x128xbf16>, vector<8x128xf32> -> vector<8x128xf32>
    %55 = vector.extract_strided_slice %36 {offsets = [0, 128], sizes = [8, 128], strides = [1, 1]} : vector<8x512xbf16> to vector<8x128xbf16>
    %56 = vector.extract_strided_slice %37 {offsets = [0, 128], sizes = [8, 128], strides = [1, 1]} : vector<8x512xbf16> to vector<8x128xbf16>
    %57 = vector.extract_strided_slice %38 {offsets = [0, 128], sizes = [8, 128], strides = [1, 1]} : vector<8x512xbf16> to vector<8x128xbf16>
    %cst_39 = arith.constant dense<0.000000e+00> : vector<8x8xf32>
    %58 = tpu.matmul %55, %56, %cst_39 {dimension_numbers = #tpu.dot_dimension_numbers<[1], [1], [0], [0], [0, 0, 1, 0], [], []>} : vector<8x128xbf16>, vector<8x128xbf16>, vector<8x8xf32> -> vector<8x8xf32>
    %cst_40 = arith.constant dense<0xFF800000> : vector<8xf32>
    %59 = vector.multi_reduction <maximumf>, %58, %cst_40 [1] : vector<8x8xf32> to vector<8xf32>
    %60 = vector.shape_cast %59 : vector<8xf32> to vector<8x1xf32>
    %61 = vector.broadcast %60 : vector<8x1xf32> to vector<8x8xf32>
    %62 = arith.subf %58, %61 : vector<8x8xf32>
    %63 = math.exp %62 : vector<8x8xf32>
    %cst_41 = arith.constant dense<0.000000e+00> : vector<8xf32>
    %64 = vector.multi_reduction <add>, %63, %cst_41 [1] : vector<8x8xf32> to vector<8xf32>
    %65 = vector.shape_cast %64 : vector<8xf32> to vector<8x1xf32>
    %66 = tpu.reciprocal %65 {approx = true} : vector<8x1xf32> -> vector<8x1xf32>
    %67 = vector.broadcast %66 : vector<8x1xf32> to vector<8x8xf32>
    %68 = arith.mulf %63, %67 : vector<8x8xf32>
    %69 = arith.truncf %68 : vector<8x8xf32> to vector<8x8xbf16>
    %cst_42 = arith.constant dense<0.000000e+00> : vector<8x128xf32>
    %70 = tpu.matmul %69, %57, %cst_42 {dimension_numbers = #tpu.dot_dimension_numbers<[1], [0], [0], [1], [0, 0, 1, 1], [], []>} : vector<8x8xbf16>, vector<8x128xbf16>, vector<8x128xf32> -> vector<8x128xf32>
    %71 = vector.extract_strided_slice %36 {offsets = [0, 256], sizes = [8, 128], strides = [1, 1]} : vector<8x512xbf16> to vector<8x128xbf16>
    %72 = vector.extract_strided_slice %37 {offsets = [0, 256], sizes = [8, 128], strides = [1, 1]} : vector<8x512xbf16> to vector<8x128xbf16>
    %73 = vector.extract_strided_slice %38 {offsets = [0, 256], sizes = [8, 128], strides = [1, 1]} : vector<8x512xbf16> to vector<8x128xbf16>
    %cst_43 = arith.constant dense<0.000000e+00> : vector<8x8xf32>
    %74 = tpu.matmul %71, %72, %cst_43 {dimension_numbers = #tpu.dot_dimension_numbers<[1], [1], [0], [0], [0, 0, 1, 0], [], []>} : vector<8x128xbf16>, vector<8x128xbf16>, vector<8x8xf32> -> vector<8x8xf32>
    %cst_44 = arith.constant dense<0xFF800000> : vector<8xf32>
    %75 = vector.multi_reduction <maximumf>, %74, %cst_44 [1] : vector<8x8xf32> to vector<8xf32>
    %76 = vector.shape_cast %75 : vector<8xf32> to vector<8x1xf32>
    %77 = vector.broadcast %76 : vector<8x1xf32> to vector<8x8xf32>
    %78 = arith.subf %74, %77 : vector<8x8xf32>
    %79 = math.exp %78 : vector<8x8xf32>
    %cst_45 = arith.constant dense<0.000000e+00> : vector<8xf32>
    %80 = vector.multi_reduction <add>, %79, %cst_45 [1] : vector<8x8xf32> to vector<8xf32>
    %81 = vector.shape_cast %80 : vector<8xf32> to vector<8x1xf32>
    %82 = tpu.reciprocal %81 {approx = true} : vector<8x1xf32> -> vector<8x1xf32>
    %83 = vector.broadcast %82 : vector<8x1xf32> to vector<8x8xf32>
    %84 = arith.mulf %79, %83 : vector<8x8xf32>
    %85 = arith.truncf %84 : vector<8x8xf32> to vector<8x8xbf16>
    %cst_46 = arith.constant dense<0.000000e+00> : vector<8x128xf32>
    %86 = tpu.matmul %85, %73, %cst_46 {dimension_numbers = #tpu.dot_dimension_numbers<[1], [0], [0], [1], [0, 0, 1, 1], [], []>} : vector<8x8xbf16>, vector<8x128xbf16>, vector<8x128xf32> -> vector<8x128xf32>
    %87 = vector.extract_strided_slice %36 {offsets = [0, 384], sizes = [8, 128], strides = [1, 1]} : vector<8x512xbf16> to vector<8x128xbf16>
    %88 = vector.extract_strided_slice %37 {offsets = [0, 384], sizes = [8, 128], strides = [1, 1]} : vector<8x512xbf16> to vector<8x128xbf16>
    %89 = vector.extract_strided_slice %38 {offsets = [0, 384], sizes = [8, 128], strides = [1, 1]} : vector<8x512xbf16> to vector<8x128xbf16>
    %cst_47 = arith.constant dense<0.000000e+00> : vector<8x8xf32>
    %90 = tpu.matmul %87, %88, %cst_47 {dimension_numbers = #tpu.dot_dimension_numbers<[1], [1], [0], [0], [0, 0, 1, 0], [], []>} : vector<8x128xbf16>, vector<8x128xbf16>, vector<8x8xf32> -> vector<8x8xf32>
    %cst_48 = arith.constant dense<0xFF800000> : vector<8xf32>
    %91 = vector.multi_reduction <maximumf>, %90, %cst_48 [1] : vector<8x8xf32> to vector<8xf32>
    %92 = vector.shape_cast %91 : vector<8xf32> to vector<8x1xf32>
    %93 = vector.broadcast %92 : vector<8x1xf32> to vector<8x8xf32>
    %94 = arith.subf %90, %93 : vector<8x8xf32>
    %95 = math.exp %94 : vector<8x8xf32>
    %cst_49 = arith.constant dense<0.000000e+00> : vector<8xf32>
    %96 = vector.multi_reduction <add>, %95, %cst_49 [1] : vector<8x8xf32> to vector<8xf32>
    %97 = vector.shape_cast %96 : vector<8xf32> to vector<8x1xf32>
    %98 = tpu.reciprocal %97 {approx = true} : vector<8x1xf32> -> vector<8x1xf32>
    %99 = vector.broadcast %98 : vector<8x1xf32> to vector<8x8xf32>
    %100 = arith.mulf %95, %99 : vector<8x8xf32>
    %101 = arith.truncf %100 : vector<8x8xf32> to vector<8x8xbf16>
    %cst_50 = arith.constant dense<0.000000e+00> : vector<8x128xf32>
    %102 = tpu.matmul %101, %89, %cst_50 {dimension_numbers = #tpu.dot_dimension_numbers<[1], [0], [0], [1], [0, 0, 1, 1], [], []>} : vector<8x8xbf16>, vector<8x128xbf16>, vector<8x128xf32> -> vector<8x128xf32>
    %103 = tpu.concatenate %54, %70, %86, %102 in 1 : vector<8x128xf32>, vector<8x128xf32>, vector<8x128xf32>, vector<8x128xf32> -> vector<8x512xf32>
    %104 = arith.truncf %103 : vector<8x512xf32> to vector<8x512xbf16>
    %c0_51 = arith.constant 0 : index
    %c0_52 = arith.constant 0 : index
    %105 = vector.load %arg15[%c0_51, %c0_52] : memref<512x32xbf16, #tpu.memory_space<vmem>>, vector<512x32xbf16>
    %cst_53 = arith.constant dense<0.000000e+00> : vector<8x32xf32>
    %106 = tpu.matmul %104, %105, %cst_53 {dimension_numbers = #tpu.dot_dimension_numbers<[1], [0], [0], [1], [0, 0, 1, 1], [], []>} : vector<8x512xbf16>, vector<512x32xbf16>, vector<8x32xf32> -> vector<8x32xf32>
    %c0_54 = arith.constant 0 : index
    %c0_55 = arith.constant 0 : index
    %107 = vector.load %arg16[%c0_54, %c0_55] : memref<1x32xf32, #tpu.memory_space<vmem>>, vector<1x32xf32>
    %108 = vector.broadcast %107 : vector<1x32xf32> to vector<8x32xf32>
    %109 = arith.addf %106, %108 : vector<8x32xf32>
    %110 = arith.addf %1, %109 : vector<8x32xf32>
    %c0_56 = arith.constant 0 : index
    %c0_57 = arith.constant 0 : index
    %111 = vector.load %arg17[%c0_56, %c0_57] : memref<1x32xf32, #tpu.memory_space<vmem>>, vector<1x32xf32>
    %c0_58 = arith.constant 0 : index
    %c0_59 = arith.constant 0 : index
    %112 = vector.load %arg18[%c0_58, %c0_59] : memref<1x32xf32, #tpu.memory_space<vmem>>, vector<1x32xf32>
    %cst_60 = arith.constant dense<0.000000e+00> : vector<8xf32>
    %113 = vector.multi_reduction <add>, %110, %cst_60 [1] : vector<8x32xf32> to vector<8xf32>
    %114 = vector.shape_cast %113 : vector<8xf32> to vector<8x1xf32>
    %cst_61 = arith.constant 3.200000e+01 : f32
    %115 = vector.broadcast %cst_61 : f32 to vector<8x1xf32>
    %116 = arith.divf %114, %115 : vector<8x1xf32>
    %117 = vector.broadcast %116 : vector<8x1xf32> to vector<8x32xf32>
    %118 = arith.subf %110, %117 : vector<8x32xf32>
    %119 = arith.mulf %118, %118 : vector<8x32xf32>
    %cst_62 = arith.constant dense<0.000000e+00> : vector<8xf32>
    %120 = vector.multi_reduction <add>, %119, %cst_62 [1] : vector<8x32xf32> to vector<8xf32>
    %121 = vector.shape_cast %120 : vector<8xf32> to vector<8x1xf32>
    %cst_63 = arith.constant 3.200000e+01 : f32
    %122 = vector.broadcast %cst_63 : f32 to vector<8x1xf32>
    %123 = arith.divf %121, %122 : vector<8x1xf32>
    %124 = vector.broadcast %116 : vector<8x1xf32> to vector<8x32xf32>
    %125 = arith.subf %110, %124 : vector<8x32xf32>
    %cst_64 = arith.constant 9.99999974E-6 : f32
    %126 = vector.broadcast %cst_64 : f32 to vector<8x1xf32>
    %127 = arith.addf %123, %126 : vector<8x1xf32>
    %128 = math.rsqrt %127 : vector<8x1xf32>
    %129 = vector.broadcast %128 : vector<8x1xf32> to vector<8x32xf32>
    %130 = arith.mulf %125, %129 : vector<8x32xf32>
    %131 = vector.broadcast %111 : vector<1x32xf32> to vector<8x32xf32>
    %132 = arith.mulf %130, %131 : vector<8x32xf32>
    %133 = vector.broadcast %112 : vector<1x32xf32> to vector<8x32xf32>
    %134 = arith.addf %132, %133 : vector<8x32xf32>
    %135 = arith.addf %134, %3 : vector<8x32xf32>
    %136 = arith.truncf %135 : vector<8x32xf32> to vector<8x32xbf16>
    %c0_65 = arith.constant 0 : index
    %c0_66 = arith.constant 0 : index
    %137 = vector.load %arg19[%c0_65, %c0_66] : memref<32x512xbf16, #tpu.memory_space<vmem>>, vector<32x512xbf16>
    %cst_67 = arith.constant dense<0.000000e+00> : vector<8x512xf32>
    %138 = tpu.matmul %136, %137, %cst_67 {dimension_numbers = #tpu.dot_dimension_numbers<[1], [0], [0], [1], [0, 0, 1, 1], [], []>} : vector<8x32xbf16>, vector<32x512xbf16>, vector<8x512xf32> -> vector<8x512xf32>
    %c0_68 = arith.constant 0 : index
    %c0_69 = arith.constant 0 : index
    %139 = vector.load %arg20[%c0_68, %c0_69] : memref<1x512xf32, #tpu.memory_space<vmem>>, vector<1x512xf32>
    %140 = vector.broadcast %139 : vector<1x512xf32> to vector<8x512xf32>
    %141 = arith.addf %138, %140 : vector<8x512xf32>
    %142 = arith.addf %9, %11 : vector<16x32xf32>
    %143 = arith.truncf %142 : vector<16x32xf32> to vector<16x32xbf16>
    %c0_70 = arith.constant 0 : index
    %c0_71 = arith.constant 0 : index
    %144 = vector.load %arg21[%c0_70, %c0_71] : memref<32x512xbf16, #tpu.memory_space<vmem>>, vector<32x512xbf16>
    %cst_72 = arith.constant dense<0.000000e+00> : vector<16x512xf32>
    %145 = tpu.matmul %143, %144, %cst_72 {dimension_numbers = #tpu.dot_dimension_numbers<[1], [0], [0], [1], [0, 0, 1, 1], [], []>} : vector<16x32xbf16>, vector<32x512xbf16>, vector<16x512xf32> -> vector<16x512xf32>
    %c0_73 = arith.constant 0 : index
    %c0_74 = arith.constant 0 : index
    %146 = vector.load %arg22[%c0_73, %c0_74] : memref<1x512xf32, #tpu.memory_space<vmem>>, vector<1x512xf32>
    %147 = vector.broadcast %146 : vector<1x512xf32> to vector<16x512xf32>
    %148 = arith.addf %145, %147 : vector<16x512xf32>
    %149 = arith.truncf %13 : vector<16x32xf32> to vector<16x32xbf16>
    %c0_75 = arith.constant 0 : index
    %c0_76 = arith.constant 0 : index
    %150 = vector.load %arg23[%c0_75, %c0_76] : memref<32x512xbf16, #tpu.memory_space<vmem>>, vector<32x512xbf16>
    %cst_77 = arith.constant dense<0.000000e+00> : vector<16x512xf32>
    %151 = tpu.matmul %149, %150, %cst_77 {dimension_numbers = #tpu.dot_dimension_numbers<[1], [0], [0], [1], [0, 0, 1, 1], [], []>} : vector<16x32xbf16>, vector<32x512xbf16>, vector<16x512xf32> -> vector<16x512xf32>
    %c0_78 = arith.constant 0 : index
    %c0_79 = arith.constant 0 : index
    %152 = vector.load %arg24[%c0_78, %c0_79] : memref<1x512xf32, #tpu.memory_space<vmem>>, vector<1x512xf32>
    %153 = vector.broadcast %152 : vector<1x512xf32> to vector<16x512xf32>
    %154 = arith.addf %151, %153 : vector<16x512xf32>
    %cst_80 = arith.constant 0.353553385 : f32
    %155 = vector.broadcast %cst_80 : f32 to vector<8x512xf32>
    %156 = arith.mulf %141, %155 : vector<8x512xf32>
    %157 = arith.truncf %156 : vector<8x512xf32> to vector<8x512xbf16>
    %158 = arith.truncf %148 : vector<16x512xf32> to vector<16x512xbf16>
    %159 = arith.truncf %154 : vector<16x512xf32> to vector<16x512xbf16>
    %160 = vector.extract_strided_slice %157 {offsets = [0, 0], sizes = [8, 128], strides = [1, 1]} : vector<8x512xbf16> to vector<8x128xbf16>
    %161 = vector.extract_strided_slice %158 {offsets = [0, 0], sizes = [16, 128], strides = [1, 1]} : vector<16x512xbf16> to vector<16x128xbf16>
    %162 = vector.extract_strided_slice %159 {offsets = [0, 0], sizes = [16, 128], strides = [1, 1]} : vector<16x512xbf16> to vector<16x128xbf16>
    %cst_81 = arith.constant dense<0.000000e+00> : vector<8x16xf32>
    %163 = tpu.matmul %160, %161, %cst_81 {dimension_numbers = #tpu.dot_dimension_numbers<[1], [1], [0], [0], [0, 0, 1, 0], [], []>} : vector<8x128xbf16>, vector<16x128xbf16>, vector<8x16xf32> -> vector<8x16xf32>
    %cst_82 = arith.constant dense<0xFF800000> : vector<8xf32>
    %164 = vector.multi_reduction <maximumf>, %163, %cst_82 [1] : vector<8x16xf32> to vector<8xf32>
    %165 = vector.shape_cast %164 : vector<8xf32> to vector<8x1xf32>
    %166 = vector.broadcast %165 : vector<8x1xf32> to vector<8x16xf32>
    %167 = arith.subf %163, %166 : vector<8x16xf32>
    %168 = math.exp %167 : vector<8x16xf32>
    %cst_83 = arith.constant dense<0.000000e+00> : vector<8xf32>
    %169 = vector.multi_reduction <add>, %168, %cst_83 [1] : vector<8x16xf32> to vector<8xf32>
    %170 = vector.shape_cast %169 : vector<8xf32> to vector<8x1xf32>
    %171 = tpu.reciprocal %170 {approx = true} : vector<8x1xf32> -> vector<8x1xf32>
    %172 = vector.broadcast %171 : vector<8x1xf32> to vector<8x16xf32>
    %173 = arith.mulf %168, %172 : vector<8x16xf32>
    %174 = arith.truncf %173 : vector<8x16xf32> to vector<8x16xbf16>
    %cst_84 = arith.constant dense<0.000000e+00> : vector<8x128xf32>
    %175 = tpu.matmul %174, %162, %cst_84 {dimension_numbers = #tpu.dot_dimension_numbers<[1], [0], [0], [1], [0, 0, 1, 1], [], []>} : vector<8x16xbf16>, vector<16x128xbf16>, vector<8x128xf32> -> vector<8x128xf32>
    %176 = vector.extract_strided_slice %157 {offsets = [0, 128], sizes = [8, 128], strides = [1, 1]} : vector<8x512xbf16> to vector<8x128xbf16>
    %177 = vector.extract_strided_slice %158 {offsets = [0, 128], sizes = [16, 128], strides = [1, 1]} : vector<16x512xbf16> to vector<16x128xbf16>
    %178 = vector.extract_strided_slice %159 {offsets = [0, 128], sizes = [16, 128], strides = [1, 1]} : vector<16x512xbf16> to vector<16x128xbf16>
    %cst_85 = arith.constant dense<0.000000e+00> : vector<8x16xf32>
    %179 = tpu.matmul %176, %177, %cst_85 {dimension_numbers = #tpu.dot_dimension_numbers<[1], [1], [0], [0], [0, 0, 1, 0], [], []>} : vector<8x128xbf16>, vector<16x128xbf16>, vector<8x16xf32> -> vector<8x16xf32>
    %cst_86 = arith.constant dense<0xFF800000> : vector<8xf32>
    %180 = vector.multi_reduction <maximumf>, %179, %cst_86 [1] : vector<8x16xf32> to vector<8xf32>
    %181 = vector.shape_cast %180 : vector<8xf32> to vector<8x1xf32>
    %182 = vector.broadcast %181 : vector<8x1xf32> to vector<8x16xf32>
    %183 = arith.subf %179, %182 : vector<8x16xf32>
    %184 = math.exp %183 : vector<8x16xf32>
    %cst_87 = arith.constant dense<0.000000e+00> : vector<8xf32>
    %185 = vector.multi_reduction <add>, %184, %cst_87 [1] : vector<8x16xf32> to vector<8xf32>
    %186 = vector.shape_cast %185 : vector<8xf32> to vector<8x1xf32>
    %187 = tpu.reciprocal %186 {approx = true} : vector<8x1xf32> -> vector<8x1xf32>
    %188 = vector.broadcast %187 : vector<8x1xf32> to vector<8x16xf32>
    %189 = arith.mulf %184, %188 : vector<8x16xf32>
    %190 = arith.truncf %189 : vector<8x16xf32> to vector<8x16xbf16>
    %cst_88 = arith.constant dense<0.000000e+00> : vector<8x128xf32>
    %191 = tpu.matmul %190, %178, %cst_88 {dimension_numbers = #tpu.dot_dimension_numbers<[1], [0], [0], [1], [0, 0, 1, 1], [], []>} : vector<8x16xbf16>, vector<16x128xbf16>, vector<8x128xf32> -> vector<8x128xf32>
    %192 = vector.extract_strided_slice %157 {offsets = [0, 256], sizes = [8, 128], strides = [1, 1]} : vector<8x512xbf16> to vector<8x128xbf16>
    %193 = vector.extract_strided_slice %158 {offsets = [0, 256], sizes = [16, 128], strides = [1, 1]} : vector<16x512xbf16> to vector<16x128xbf16>
    %194 = vector.extract_strided_slice %159 {offsets = [0, 256], sizes = [16, 128], strides = [1, 1]} : vector<16x512xbf16> to vector<16x128xbf16>
    %cst_89 = arith.constant dense<0.000000e+00> : vector<8x16xf32>
    %195 = tpu.matmul %192, %193, %cst_89 {dimension_numbers = #tpu.dot_dimension_numbers<[1], [1], [0], [0], [0, 0, 1, 0], [], []>} : vector<8x128xbf16>, vector<16x128xbf16>, vector<8x16xf32> -> vector<8x16xf32>
    %cst_90 = arith.constant dense<0xFF800000> : vector<8xf32>
    %196 = vector.multi_reduction <maximumf>, %195, %cst_90 [1] : vector<8x16xf32> to vector<8xf32>
    %197 = vector.shape_cast %196 : vector<8xf32> to vector<8x1xf32>
    %198 = vector.broadcast %197 : vector<8x1xf32> to vector<8x16xf32>
    %199 = arith.subf %195, %198 : vector<8x16xf32>
    %200 = math.exp %199 : vector<8x16xf32>
    %cst_91 = arith.constant dense<0.000000e+00> : vector<8xf32>
    %201 = vector.multi_reduction <add>, %200, %cst_91 [1] : vector<8x16xf32> to vector<8xf32>
    %202 = vector.shape_cast %201 : vector<8xf32> to vector<8x1xf32>
    %203 = tpu.reciprocal %202 {approx = true} : vector<8x1xf32> -> vector<8x1xf32>
    %204 = vector.broadcast %203 : vector<8x1xf32> to vector<8x16xf32>
    %205 = arith.mulf %200, %204 : vector<8x16xf32>
    %206 = arith.truncf %205 : vector<8x16xf32> to vector<8x16xbf16>
    %cst_92 = arith.constant dense<0.000000e+00> : vector<8x128xf32>
    %207 = tpu.matmul %206, %194, %cst_92 {dimension_numbers = #tpu.dot_dimension_numbers<[1], [0], [0], [1], [0, 0, 1, 1], [], []>} : vector<8x16xbf16>, vector<16x128xbf16>, vector<8x128xf32> -> vector<8x128xf32>
    %208 = vector.extract_strided_slice %157 {offsets = [0, 384], sizes = [8, 128], strides = [1, 1]} : vector<8x512xbf16> to vector<8x128xbf16>
    %209 = vector.extract_strided_slice %158 {offsets = [0, 384], sizes = [16, 128], strides = [1, 1]} : vector<16x512xbf16> to vector<16x128xbf16>
    %210 = vector.extract_strided_slice %159 {offsets = [0, 384], sizes = [16, 128], strides = [1, 1]} : vector<16x512xbf16> to vector<16x128xbf16>
    %cst_93 = arith.constant dense<0.000000e+00> : vector<8x16xf32>
    %211 = tpu.matmul %208, %209, %cst_93 {dimension_numbers = #tpu.dot_dimension_numbers<[1], [1], [0], [0], [0, 0, 1, 0], [], []>} : vector<8x128xbf16>, vector<16x128xbf16>, vector<8x16xf32> -> vector<8x16xf32>
    %cst_94 = arith.constant dense<0xFF800000> : vector<8xf32>
    %212 = vector.multi_reduction <maximumf>, %211, %cst_94 [1] : vector<8x16xf32> to vector<8xf32>
    %213 = vector.shape_cast %212 : vector<8xf32> to vector<8x1xf32>
    %214 = vector.broadcast %213 : vector<8x1xf32> to vector<8x16xf32>
    %215 = arith.subf %211, %214 : vector<8x16xf32>
    %216 = math.exp %215 : vector<8x16xf32>
    %cst_95 = arith.constant dense<0.000000e+00> : vector<8xf32>
    %217 = vector.multi_reduction <add>, %216, %cst_95 [1] : vector<8x16xf32> to vector<8xf32>
    %218 = vector.shape_cast %217 : vector<8xf32> to vector<8x1xf32>
    %219 = tpu.reciprocal %218 {approx = true} : vector<8x1xf32> -> vector<8x1xf32>
    %220 = vector.broadcast %219 : vector<8x1xf32> to vector<8x16xf32>
    %221 = arith.mulf %216, %220 : vector<8x16xf32>
    %222 = arith.truncf %221 : vector<8x16xf32> to vector<8x16xbf16>
    %cst_96 = arith.constant dense<0.000000e+00> : vector<8x128xf32>
    %223 = tpu.matmul %222, %210, %cst_96 {dimension_numbers = #tpu.dot_dimension_numbers<[1], [0], [0], [1], [0, 0, 1, 1], [], []>} : vector<8x16xbf16>, vector<16x128xbf16>, vector<8x128xf32> -> vector<8x128xf32>
    %224 = tpu.concatenate %175, %191, %207, %223 in 1 : vector<8x128xf32>, vector<8x128xf32>, vector<8x128xf32>, vector<8x128xf32> -> vector<8x512xf32>
    %225 = arith.truncf %224 : vector<8x512xf32> to vector<8x512xbf16>
    %c0_97 = arith.constant 0 : index
    %c0_98 = arith.constant 0 : index
    %226 = vector.load %arg25[%c0_97, %c0_98] : memref<512x32xbf16, #tpu.memory_space<vmem>>, vector<512x32xbf16>
    %cst_99 = arith.constant dense<0.000000e+00> : vector<8x32xf32>
    %227 = tpu.matmul %225, %226, %cst_99 {dimension_numbers = #tpu.dot_dimension_numbers<[1], [0], [0], [1], [0, 0, 1, 1], [], []>} : vector<8x512xbf16>, vector<512x32xbf16>, vector<8x32xf32> -> vector<8x32xf32>
    %c0_100 = arith.constant 0 : index
    %c0_101 = arith.constant 0 : index
    %228 = vector.load %arg26[%c0_100, %c0_101] : memref<1x32xf32, #tpu.memory_space<vmem>>, vector<1x32xf32>
    %229 = vector.broadcast %228 : vector<1x32xf32> to vector<8x32xf32>
    %230 = arith.addf %227, %229 : vector<8x32xf32>
    %231 = arith.addf %134, %230 : vector<8x32xf32>
    %c0_102 = arith.constant 0 : index
    %c0_103 = arith.constant 0 : index
    %232 = vector.load %arg27[%c0_102, %c0_103] : memref<1x32xf32, #tpu.memory_space<vmem>>, vector<1x32xf32>
    %c0_104 = arith.constant 0 : index
    %c0_105 = arith.constant 0 : index
    %233 = vector.load %arg28[%c0_104, %c0_105] : memref<1x32xf32, #tpu.memory_space<vmem>>, vector<1x32xf32>
    %cst_106 = arith.constant dense<0.000000e+00> : vector<8xf32>
    %234 = vector.multi_reduction <add>, %231, %cst_106 [1] : vector<8x32xf32> to vector<8xf32>
    %235 = vector.shape_cast %234 : vector<8xf32> to vector<8x1xf32>
    %cst_107 = arith.constant 3.200000e+01 : f32
    %236 = vector.broadcast %cst_107 : f32 to vector<8x1xf32>
    %237 = arith.divf %235, %236 : vector<8x1xf32>
    %238 = vector.broadcast %237 : vector<8x1xf32> to vector<8x32xf32>
    %239 = arith.subf %231, %238 : vector<8x32xf32>
    %240 = arith.mulf %239, %239 : vector<8x32xf32>
    %cst_108 = arith.constant dense<0.000000e+00> : vector<8xf32>
    %241 = vector.multi_reduction <add>, %240, %cst_108 [1] : vector<8x32xf32> to vector<8xf32>
    %242 = vector.shape_cast %241 : vector<8xf32> to vector<8x1xf32>
    %cst_109 = arith.constant 3.200000e+01 : f32
    %243 = vector.broadcast %cst_109 : f32 to vector<8x1xf32>
    %244 = arith.divf %242, %243 : vector<8x1xf32>
    %245 = vector.broadcast %237 : vector<8x1xf32> to vector<8x32xf32>
    %246 = arith.subf %231, %245 : vector<8x32xf32>
    %cst_110 = arith.constant 9.99999974E-6 : f32
    %247 = vector.broadcast %cst_110 : f32 to vector<8x1xf32>
    %248 = arith.addf %244, %247 : vector<8x1xf32>
    %249 = math.rsqrt %248 : vector<8x1xf32>
    %250 = vector.broadcast %249 : vector<8x1xf32> to vector<8x32xf32>
    %251 = arith.mulf %246, %250 : vector<8x32xf32>
    %252 = vector.broadcast %232 : vector<1x32xf32> to vector<8x32xf32>
    %253 = arith.mulf %251, %252 : vector<8x32xf32>
    %254 = vector.broadcast %233 : vector<1x32xf32> to vector<8x32xf32>
    %255 = arith.addf %253, %254 : vector<8x32xf32>
    %256 = arith.truncf %255 : vector<8x32xf32> to vector<8x32xbf16>
    %c0_111 = arith.constant 0 : index
    %c0_112 = arith.constant 0 : index
    %257 = vector.load %arg29[%c0_111, %c0_112] : memref<32x64xbf16, #tpu.memory_space<vmem>>, vector<32x64xbf16>
    %cst_113 = arith.constant dense<0.000000e+00> : vector<8x64xf32>
    %258 = tpu.matmul %256, %257, %cst_113 {dimension_numbers = #tpu.dot_dimension_numbers<[1], [0], [0], [1], [0, 0, 1, 1], [], []>} : vector<8x32xbf16>, vector<32x64xbf16>, vector<8x64xf32> -> vector<8x64xf32>
    %c0_114 = arith.constant 0 : index
    %c0_115 = arith.constant 0 : index
    %259 = vector.load %arg30[%c0_114, %c0_115] : memref<1x64xf32, #tpu.memory_space<vmem>>, vector<1x64xf32>
    %260 = vector.broadcast %259 : vector<1x64xf32> to vector<8x64xf32>
    %261 = arith.addf %258, %260 : vector<8x64xf32>
    %cst_116 = arith.constant 0.000000e+00 : f32
    %262 = vector.broadcast %cst_116 : f32 to vector<8x64xf32>
    %263 = arith.maximumf %261, %262 : vector<8x64xf32>
    %264 = arith.truncf %263 : vector<8x64xf32> to vector<8x64xbf16>
    %c0_117 = arith.constant 0 : index
    %c0_118 = arith.constant 0 : index
    %265 = vector.load %arg31[%c0_117, %c0_118] : memref<64x32xbf16, #tpu.memory_space<vmem>>, vector<64x32xbf16>
    %cst_119 = arith.constant dense<0.000000e+00> : vector<8x32xf32>
    %266 = tpu.matmul %264, %265, %cst_119 {dimension_numbers = #tpu.dot_dimension_numbers<[1], [0], [0], [1], [0, 0, 1, 1], [], []>} : vector<8x64xbf16>, vector<64x32xbf16>, vector<8x32xf32> -> vector<8x32xf32>
    %c0_120 = arith.constant 0 : index
    %c0_121 = arith.constant 0 : index
    %267 = vector.load %arg32[%c0_120, %c0_121] : memref<1x32xf32, #tpu.memory_space<vmem>>, vector<1x32xf32>
    %268 = vector.broadcast %267 : vector<1x32xf32> to vector<8x32xf32>
    %269 = arith.addf %266, %268 : vector<8x32xf32>
    %270 = arith.addf %255, %269 : vector<8x32xf32>
    %c0_122 = arith.constant 0 : index
    %c0_123 = arith.constant 0 : index
    %271 = vector.load %arg33[%c0_122, %c0_123] : memref<1x32xf32, #tpu.memory_space<vmem>>, vector<1x32xf32>
    %c0_124 = arith.constant 0 : index
    %c0_125 = arith.constant 0 : index
    %272 = vector.load %arg34[%c0_124, %c0_125] : memref<1x32xf32, #tpu.memory_space<vmem>>, vector<1x32xf32>
    %cst_126 = arith.constant dense<0.000000e+00> : vector<8xf32>
    %273 = vector.multi_reduction <add>, %270, %cst_126 [1] : vector<8x32xf32> to vector<8xf32>
    %274 = vector.shape_cast %273 : vector<8xf32> to vector<8x1xf32>
    %cst_127 = arith.constant 3.200000e+01 : f32
    %275 = vector.broadcast %cst_127 : f32 to vector<8x1xf32>
    %276 = arith.divf %274, %275 : vector<8x1xf32>
    %277 = vector.broadcast %276 : vector<8x1xf32> to vector<8x32xf32>
    %278 = arith.subf %270, %277 : vector<8x32xf32>
    %279 = arith.mulf %278, %278 : vector<8x32xf32>
    %cst_128 = arith.constant dense<0.000000e+00> : vector<8xf32>
    %280 = vector.multi_reduction <add>, %279, %cst_128 [1] : vector<8x32xf32> to vector<8xf32>
    %281 = vector.shape_cast %280 : vector<8xf32> to vector<8x1xf32>
    %cst_129 = arith.constant 3.200000e+01 : f32
    %282 = vector.broadcast %cst_129 : f32 to vector<8x1xf32>
    %283 = arith.divf %281, %282 : vector<8x1xf32>
    %284 = vector.broadcast %276 : vector<8x1xf32> to vector<8x32xf32>
    %285 = arith.subf %270, %284 : vector<8x32xf32>
    %cst_130 = arith.constant 9.99999974E-6 : f32
    %286 = vector.broadcast %cst_130 : f32 to vector<8x1xf32>
    %287 = arith.addf %283, %286 : vector<8x1xf32>
    %288 = math.rsqrt %287 : vector<8x1xf32>
    %289 = vector.broadcast %288 : vector<8x1xf32> to vector<8x32xf32>
    %290 = arith.mulf %285, %289 : vector<8x32xf32>
    %291 = vector.broadcast %271 : vector<1x32xf32> to vector<8x32xf32>
    %292 = arith.mulf %290, %291 : vector<8x32xf32>
    %293 = vector.broadcast %272 : vector<1x32xf32> to vector<8x32xf32>
    %294 = arith.addf %292, %293 : vector<8x32xf32>
    %c0_131 = arith.constant 0 : index
    %c0_132 = arith.constant 0 : index
    %c0_133 = arith.constant 0 : index
    %295 = vector.load %arg35[%c0_131, %c0_132, %c0_133] : memref<1x8x32xf32, #tpu.memory_space<vmem>>, vector<1x8x32xf32>
    %296 = vector.shape_cast %295 : vector<1x8x32xf32> to vector<8x32xf32>
    %297 = vector.shape_cast %294 : vector<8x32xf32> to vector<1x8x32xf32>
    tpu.vector_store %arg35[%c0_131, %c0_132, %c0_133], %297 {strides = array<i32>} : memref<1x8x32xf32, #tpu.memory_space<vmem>>, vector<1x8x32xf32>,
    return
  }
  func.func @transform_0(%arg0: i32, %arg1: i32) -> (i32, i32, i32) {
    %c0_i32 = arith.constant 0 : i32
    %c0_i32_0 = arith.constant 0 : i32
    return %arg0, %arg1, %c0_i32 : i32, i32, i32
  }
  func.func @transform_1(%arg0: i32, %arg1: i32) -> (i32, i32, i32) {
    %c0_i32 = arith.constant 0 : i32
    %c0_i32_0 = arith.constant 0 : i32
    return %arg0, %arg1, %c0_i32 : i32, i32, i32
  }
  func.func @transform_2(%arg0: i32, %arg1: i32) -> (i32, i32, i32) {
    %c0_i32 = arith.constant 0 : i32
    %c0_i32_0 = arith.constant 0 : i32
    %c0_i32_1 = arith.constant 0 : i32
    return %arg0, %c0_i32, %c0_i32_0 : i32, i32, i32
  }
  func.func @transform_3(%arg0: i32, %arg1: i32) -> (i32, i32, i32) {
    %c0_i32 = arith.constant 0 : i32
    %c0_i32_0 = arith.constant 0 : i32
    %c0_i32_1 = arith.constant 0 : i32
    return %arg0, %c0_i32, %c0_i32_0 : i32, i32, i32
  }
  func.func @transform_4(%arg0: i32, %arg1: i32) -> (i32, i32, i32) {
    %c0_i32 = arith.constant 0 : i32
    %c0_i32_0 = arith.constant 0 : i32
    %c0_i32_1 = arith.constant 0 : i32
    return %arg0, %c0_i32, %c0_i32_0 : i32, i32, i32
  }
  func.func @transform_5(%arg0: i32, %arg1: i32) -> (i32, i32, i32) {
    %c0_i32 = arith.constant 0 : i32
    %c0_i32_0 = arith.constant 0 : i32
    %c0_i32_1 = arith.constant 0 : i32
    return %arg0, %c0_i32, %c0_i32_0 : i32, i32, i32
  }
  func.func @transform_6(%arg0: i32, %arg1: i32) -> (i32, i32, i32) {
    %c0_i32 = arith.constant 0 : i32
    %c0_i32_0 = arith.constant 0 : i32
    %c0_i32_1 = arith.constant 0 : i32
    return %arg0, %c0_i32, %c0_i32_0 : i32, i32, i32
  }
  func.func @transform_7(%arg0: i32, %arg1: i32) -> (i32, i32) {
    %c0_i32 = arith.constant 0 : i32
    %c0_i32_0 = arith.constant 0 : i32
    %c0_i32_1 = arith.constant 0 : i32
    return %c0_i32, %c0_i32_0 : i32, i32
  }
  func.func @transform_8(%arg0: i32, %arg1: i32) -> (i32, i32) {
    %c0_i32 = arith.constant 0 : i32
    %c0_i32_0 = arith.constant 0 : i32
    %c0_i32_1 = arith.constant 0 : i32
    return %c0_i32, %c0_i32_0 : i32, i32
  }
  func.func @transform_9(%arg0: i32, %arg1: i32) -> (i32, i32) {
    %c0_i32 = arith.constant 0 : i32
    %c0_i32_0 = arith.constant 0 : i32
    %c0_i32_1 = arith.constant 0 : i32
    return %c0_i32, %c0_i32_0 : i32, i32
  }
  func.func @transform_10(%arg0: i32, %arg1: i32) -> (i32, i32) {
    %c0_i32 = arith.constant 0 : i32
    %c0_i32_0 = arith.constant 0 : i32
    %c0_i32_1 = arith.constant 0 : i32
    return %c0_i32, %c0_i32_0 : i32, i32
  }
  func.func @transform_11(%arg0: i32, %arg1: i32) -> (i32, i32) {
    %c0_i32 = arith.constant 0 : i32
    %c0_i32_0 = arith.constant 0 : i32
    %c0_i32_1 = arith.constant 0 : i32
    return %c0_i32, %c0_i32_0 : i32, i32
  }
  func.func @transform_12(%arg0: i32, %arg1: i32) -> (i32, i32) {
    %c0_i32 = arith.constant 0 : i32
    %c0_i32_0 = arith.constant 0 : i32
    %c0_i32_1 = arith.constant 0 : i32
    return %c0_i32, %c0_i32_0 : i32, i32
  }
  func.func @transform_13(%arg0: i32, %arg1: i32) -> (i32, i32) {
    %c0_i32 = arith.constant 0 : i32
    %c0_i32_0 = arith.constant 0 : i32
    %c0_i32_1 = arith.constant 0 : i32
    return %c0_i32, %c0_i32_0 : i32, i32
  }
  func.func @transform_14(%arg0: i32, %arg1: i32) -> (i32, i32) {
    %c0_i32 = arith.constant 0 : i32
    %c0_i32_0 = arith.constant 0 : i32
    %c0_i32_1 = arith.constant 0 : i32
    return %c0_i32, %c0_i32_0 : i32, i32
  }
  func.func @transform_15(%arg0: i32, %arg1: i32) -> (i32, i32) {
    %c0_i32 = arith.constant 0 : i32
    %c0_i32_0 = arith.constant 0 : i32
    %c0_i32_1 = arith.constant 0 : i32
    return %c0_i32, %c0_i32_0 : i32, i32
  }
  func.func @transform_16(%arg0: i32, %arg1: i32) -> (i32, i32) {
    %c0_i32 = arith.constant 0 : i32
    %c0_i32_0 = arith.constant 0 : i32
    %c0_i32_1 = arith.constant 0 : i32
    return %c0_i32, %c0_i32_0 : i32, i32
  }
  func.func @transform_17(%arg0: i32, %arg1: i32) -> (i32, i32) {
    %c0_i32 = arith.constant 0 : i32
    %c0_i32_0 = arith.constant 0 : i32
    %c0_i32_1 = arith.constant 0 : i32
    return %c0_i32, %c0_i32_0 : i32, i32
  }
  func.func @transform_18(%arg0: i32, %arg1: i32) -> (i32, i32) {
    %c0_i32 = arith.constant 0 : i32
    %c0_i32_0 = arith.constant 0 : i32
    %c0_i32_1 = arith.constant 0 : i32
    return %c0_i32, %c0_i32_0 : i32, i32
  }
  func.func @transform_19(%arg0: i32, %arg1: i32) -> (i32, i32) {
    %c0_i32 = arith.constant 0 : i32
    %c0_i32_0 = arith.constant 0 : i32
    %c0_i32_1 = arith.constant 0 : i32
    return %c0_i32, %c0_i32_0 : i32, i32
  }
  func.func @transform_20(%arg0: i32, %arg1: i32) -> (i32, i32) {
    %c0_i32 = arith.constant 0 : i32
    %c0_i32_0 = arith.constant 0 : i32
    %c0_i32_1 = arith.constant 0 : i32
    return %c0_i32, %c0_i32_0 : i32, i32
  }
  func.func @transform_21(%arg0: i32, %arg1: i32) -> (i32, i32) {
    %c0_i32 = arith.constant 0 : i32
    %c0_i32_0 = arith.constant 0 : i32
    %c0_i32_1 = arith.constant 0 : i32
    return %c0_i32, %c0_i32_0 : i32, i32
  }
  func.func @transform_22(%arg0: i32, %arg1: i32) -> (i32, i32) {
    %c0_i32 = arith.constant 0 : i32
    %c0_i32_0 = arith.constant 0 : i32
    %c0_i32_1 = arith.constant 0 : i32
    return %c0_i32, %c0_i32_0 : i32, i32
  }
  func.func @transform_23(%arg0: i32, %arg1: i32) -> (i32, i32) {
    %c0_i32 = arith.constant 0 : i32
    %c0_i32_0 = arith.constant 0 : i32
    %c0_i32_1 = arith.constant 0 : i32
    return %c0_i32, %c0_i32_0 : i32, i32
  }
  func.func @transform_24(%arg0: i32, %arg1: i32) -> (i32, i32) {
    %c0_i32 = arith.constant 0 : i32
    %c0_i32_0 = arith.constant 0 : i32
    %c0_i32_1 = arith.constant 0 : i32
    return %c0_i32, %c0_i32_0 : i32, i32
  }
  func.func @transform_25(%arg0: i32, %arg1: i32) -> (i32, i32) {
    %c0_i32 = arith.constant 0 : i32
    %c0_i32_0 = arith.constant 0 : i32
    %c0_i32_1 = arith.constant 0 : i32
    return %c0_i32, %c0_i32_0 : i32, i32
  }
  func.func @transform_26(%arg0: i32, %arg1: i32) -> (i32, i32) {
    %c0_i32 = arith.constant 0 : i32
    %c0_i32_0 = arith.constant 0 : i32
    %c0_i32_1 = arith.constant 0 : i32
    return %c0_i32, %c0_i32_0 : i32, i32
  }
  func.func @transform_27(%arg0: i32, %arg1: i32) -> (i32, i32) {
    %c0_i32 = arith.constant 0 : i32
    %c0_i32_0 = arith.constant 0 : i32
    %c0_i32_1 = arith.constant 0 : i32
    return %c0_i32, %c0_i32_0 : i32, i32
  }
  func.func @transform_28(%arg0: i32, %arg1: i32) -> (i32, i32) {
    %c0_i32 = arith.constant 0 : i32
    %c0_i32_0 = arith.constant 0 : i32
    %c0_i32_1 = arith.constant 0 : i32
    return %c0_i32, %c0_i32_0 : i32, i32
  }
  func.func @transform_29(%arg0: i32, %arg1: i32) -> (i32, i32) {
    %c0_i32 = arith.constant 0 : i32
    %c0_i32_0 = arith.constant 0 : i32
    %c0_i32_1 = arith.constant 0 : i32
    return %c0_i32, %c0_i32_0 : i32, i32
  }
  func.func @transform_30(%arg0: i32, %arg1: i32) -> (i32, i32) {
    %c0_i32 = arith.constant 0 : i32
    %c0_i32_0 = arith.constant 0 : i32
    %c0_i32_1 = arith.constant 0 : i32
    return %c0_i32, %c0_i32_0 : i32, i32
  }
  func.func @transform_31(%arg0: i32, %arg1: i32) -> (i32, i32) {
    %c0_i32 = arith.constant 0 : i32
    %c0_i32_0 = arith.constant 0 : i32
    %c0_i32_1 = arith.constant 0 : i32
    return %c0_i32, %c0_i32_0 : i32, i32
  }
  func.func @transform_32(%arg0: i32, %arg1: i32) -> (i32, i32) {
    %c0_i32 = arith.constant 0 : i32
    %c0_i32_0 = arith.constant 0 : i32
    %c0_i32_1 = arith.constant 0 : i32
    return %c0_i32, %c0_i32_0 : i32, i32
  }
  func.func @transform_33(%arg0: i32, %arg1: i32) -> (i32, i32, i32) {
    %c0_i32 = arith.constant 0 : i32
    %c0_i32_0 = arith.constant 0 : i32
    return %arg0, %arg1, %c0_i32 : i32, i32, i32
  }
}

</mosaic_0001>

<bundles_post_ra>
// kernel: tpu_custom_call.1
= control target key start
LH: loop header
LB: loop body
LE: loop exit
PB: predicated region body
PF: predicated region fallthrough
CT: control target
= control target key end

     0   :  { %s5141_s6 = smov 1   ;;  %s5142_s10 = smov 2   ;;  %s5859_s0 = inlined_call_operand.smem [shape: u32[34], index: -1, kind: input, shape index: {}] }
   0x1   :  { %s5191_s5 = sld [smem:[%s5859_s0]]   ;;  %s5143_s14 = smov 3  }
   0x2   :  { %s5196_s9 = sld [smem:[%s5859_s0 + %s5141_s6]]   ;;  %s5144_s18 = smov 4  }
   0x3   :  { %s5201_s13 = sld [smem:[%s5859_s0 + %s5142_s10]]   ;;  %s5145_s22 = smov 5  }
   0x4   :  { %s5206_s17 = sld [smem:[%s5859_s0 + %s5143_s14]]   ;;  %s5146_s26 = smov 6  }
   0x5   :  { %s5211_s21 = sld [smem:[%s5859_s0 + %s5144_s18]]   ;;  %s5147_s30 = smov 7  }
   0x6   :  { %s5216_s25 = sld [smem:[%s5859_s0 + %s5145_s22]]   ;;  %s5148_s4 = smov 8  }
   0x7   :  { %5881 = sst [smem:[#allocation16_spill]] %s5191_s5  ;;  %s5149_s10 = smov 9  }
   0x8   :  { %5882 = sst [smem:[#allocation17_spill]] %s5196_s9  ;;  %s5150_s15 = smov 10  }
   0x9   :  { %s5221_s29 = sld [smem:[%s5859_s0 + %s5146_s26]]   ;;  %s5151_s20 = smov 11  }
   0xa   :  { %s5226_s3 = sld [smem:[%s5859_s0 + %s5147_s30]]   ;;  %s5152_s26 = smov 12  }
   0xb   :  { %5883 = sst [smem:[#allocation18_spill]] %s5211_s21  ;;  %s5153_s1 = smov 13  }
   0xc   :  { %5884 = sst [smem:[#allocation19_spill]] %s5216_s25  ;;  %s5154_s7 = smov 14  }
   0xd   :  { %s5231_s8 = sld [smem:[%s5859_s0 + %s5148_s4]]   ;;  %s5156_s22 = smov 16  }
   0xe   :  { %s5236_s14 = sld [smem:[%s5859_s0 + %s5149_s10]]   ;;  %s5157_s28 = smov 17  }
   0xf   :  { %5885 = sst [smem:[#allocation20_spill]] %s5221_s29 }
  0x10   :  { %5886 = sst [smem:[#allocation21_spill]] %s5226_s3 }
  0x11   :  { %s5241_s19 = sld [smem:[%s5859_s0 + %s5150_s15]]   ;;  %s5155_s15 = smov 15  }
  0x12   :  { %s5246_s24 = sld [smem:[%s5859_s0 + %s5151_s20]]  }
  0x13   :  { %5887 = sst [smem:[#allocation22_spill]] %s5231_s8 }
  0x14   :  { %s5251_s30 = sld [smem:[%s5859_s0 + %s5152_s26]]  }
  0x15   :  { %s5256_s6 = sld [smem:[%s5859_s0 + %s5153_s1]]  }
  0x16   :  { %s5261_s12 = sld [smem:[%s5859_s0 + %s5154_s7]]   ;;  %s5158_s7 = smov 18  }
  0x17   :  { %s5266_s20 = sld [smem:[%s5859_s0 + %s5155_s15]]   ;;  %s5159_s15 = smov 19  }
  0x18   :  { %s5271_s27 = sld [smem:[%s5859_s0 + %s5156_s22]]   ;;  %s5160_s22 = smov 20  }
  0x19   :  { %s5276_s4 = sld [smem:[%s5859_s0 + %s5157_s28]]   ;;  %s5161_s28 = smov 21  }
  0x1a   :  { %5888 = sst [smem:[#allocation23_spill]] %s5251_s30 }
  0x1b   :  { %5889 = sst [smem:[#allocation24_spill]] %s5256_s6 }
  0x1c   :  { %s5281_s29 = sld [smem:[%s5859_s0 + %s5158_s7]]   ;;  %s5162_s7 = smov 22  }
  0x1d   :  { %5890 = sst [smem:[#allocation25_spill]] %s5266_s20 }
  0x1e   :  { %s5286_s25 = sld [smem:[%s5859_s0 + %s5159_s15]]   ;;  %s5163_s15 = smov 23  }
  0x1f   :  { %5891 = sst [smem:[#allocation26_spill]] %s5276_s4 }
  0x20   :  { %s5291_s21 = sld [smem:[%s5859_s0 + %s5160_s22]]   ;;  %s5164_s22 = smov 24  }
  0x21   :  { %s5296_s4 = sld [smem:[%s5859_s0 + %s5161_s28]]   ;;  %s5165_s28 = smov 25  }
  0x22   :  { %5892 = sst [smem:[#allocation27_spill]] %s5281_s29 }
  0x23   :  { %s5301_s29 = sld [smem:[%s5859_s0 + %s5162_s7]]   ;;  %s5166_s7 = smov 26  }
  0x24   :  { %5893 = sst [smem:[#allocation28_spill]] %s5286_s25 }
  0x25   :  { %s5306_s25 = sld [smem:[%s5859_s0 + %s5163_s15]]   ;;  %s5167_s15 = smov 27  }
  0x26   :  { %5894 = sst [smem:[#allocation29_spill]] %s5291_s21 }
  0x27   :  { %5895 = sst [smem:[#allocation30_spill]] %s5296_s4 }
  0x28   :  { %s5311_s21 = sld [smem:[%s5859_s0 + %s5164_s22]]   ;;  %s5168_s22 = smov 28  }
  0x29   :  { %s5316_s4 = sld [smem:[%s5859_s0 + %s5165_s28]]   ;;  %s5169_s28 = smov 29  }
  0x2a   :  { %s5321_s6 = sld [smem:[%s5859_s0 + %s5166_s7]]   ;;  %s5170_s7 = smov 30  }
  0x2b   :  { %5896 = sst [smem:[#allocation31_spill]] %s5306_s25 }
  0x2c   :  { %s5326_s25 = sld [smem:[%s5859_s0 + %s5167_s15]]   ;;  %s5171_s15 = smov 31  }
  0x2d   :  { %s5331_s30 = sld [smem:[%s5859_s0 + %s5168_s22]]   ;;  %s5172_s22 = smov 32  }
  0x2f   :  { %5897 = sst [smem:[#allocation32_spill]] %s5316_s4 }
  0x30   :  { %5898 = sst [smem:[#allocation33_spill]] %s5321_s6 }
  0x31   :  { %s5336_s4 = sld [smem:[%s5859_s0 + %s5169_s28]]   ;;  %s5173_s28 = smov 33  }
  0x32   :  { %5899 = sst [smem:[#allocation34_spill]] %s5326_s25 }
  0x33   :  { %5900 = sst [smem:[#allocation35_spill]] %s5331_s30 }
  0x34   :  { %s5341_s6 = sld [smem:[%s5859_s0 + %s5170_s7]]  }
  0x35   :  { %s5346_s25 = sld [smem:[%s5859_s0 + %s5171_s15]]  }
  0x36   :  { %s5351_s30 = sld [smem:[%s5859_s0 + %s5172_s22]]  }
  0x37   :  { %5901 = sst [smem:[#allocation36_spill]] %s5336_s4 }
  0x38   :  { %s5356_s4 = sld [smem:[%s5859_s0 + %s5173_s28]]  }
  0x3a   :  { %5902 = sst [smem:[#allocation37_spill]] %s5341_s6 }
  0x3c   :  { %5903 = sst [smem:[#allocation38_spill]] %s5351_s30 }
  0x3e   :  { %5904 = sst [smem:[#allocation39_spill]] %s5356_s4 }
  0x3f   :  { %72 = vsyncpa [#allocation3], 0 }
  0x40   :  { %73 = vsyncpa [#allocation6], 0 }
  0x41   :  { %74 = vsyncpa [#allocation9], 0 }
  0x42   :  { %75 = vsyncpa [#allocation4], 0 }
  0x43   :  { %77 = vsyncpa [#allocation4 + $0x1], 0  ;;  %s5358_s7 = smov 0   ;;  %s5360_s10 = smov 0  }
  0x44   :  { %s5362_s11 = smov 0   ;;  %s5364_s15 = smov 0  }
  0x45   :  { %s5366_s16 = smov 0   ;;  %s5368_s18 = smov 0  }
  0x46 LB: > { %s5905_s3 = sld [smem:[#allocation21_spill]]  ;;  %s4170_s0 = sadd.s32 4294967295, %s5139_s18   ;;  %s5119_s7 = sphi %s5358_s7, %s5953_s7   ;;  %s5139_s18 = sphi %s5368_s18, %s83_s18   ;;  %s5135_s16 = sphi %s5366_s16, %s5952_s16   ;;  %s5131_s15 = sphi %s5364_s15, %s5951_s15   ;;  %s5127_s11 = sphi %s5362_s11, %s5950_s11   ;;  %s5123_s10 = sphi %s5360_s10, %s5954_s10  }
  0x47   : > { %5906 = sst [smem:[#allocation40_spill]] %s5119_s7  ;;  %s4171_s22 = sadd.s32 4294967294, %s5139_s18  }
  0x48   : > { %5907 = sst [smem:[#allocation41_spill]] %s5127_s11  ;;  %s95_s23 = sadd.s32 1, %s5135_s16 }
  0x49   : > { %5908 = sst [smem:[#allocation42_spill]] %s5135_s16  ;;  %s836_s26 = sadd.s32 1, %s5127_s11 }
  0x4a   : > { %p97_p0 = scmp.ge.s32.totalorder %s95_s23, 2  ;;  %p846_p1 = scmp.ne.s32.totalorder %s5127_s11, %s5123_s10 }
  0x4b   : > { %p847_p2 = scmp.eq.s32.totalorder %s4170_s0, 1  ;;  %p852_p3 = scmp.ne.s32.totalorder %s5123_s10, %s5119_s7 }
  0x4c   : > { %s5956_s23 = smov (%p97_p0, %s95_s23), 0  ;;  %p853_p5 = scmp.eq.s32.totalorder %s4171_s22, 1 }
  0x4d   : > { %5909 = sst [smem:[#allocation43_spill]] %s5956_s23  ;;  %p5398_p4 = por %p847_p2, %p846_p1 }
  0x4e   : > { %s831_s1 = ssub.s32 %s5135_s16, %s5956_s23  ;;  %p4172_p6 = scmp.ge.s32.totalorder %s5139_s18, 1 }
  0x4f   : > { %s5910_s28 = scalar_select %p5398_p4, 1, 0 }
  0x50   : > { %p834_p7 = scmp.eq.s32.totalorder %s831_s1, 0  ;;  %p5405_p8 = por %p853_p5, %p852_p3 }
  0x51   : > { %p860_p9 = scmp.lt.s32.totalorder %s5139_s18, 3  ;;  %p5417_p11 = scmp.eq.s32.totalorder %s4170_s0, 0 }
  0x52   : > { %s5911_s2 = scalar_select %p5405_p8, 1, 0 }
  0x53   : > { %s5411_s4 = scalar_select %p834_p7, %s5127_s11, %s836_s26  }
  0x54   : > { %5912 = sst [smem:[#allocation44_spill]] %s5911_s2  ;;  %p5413_p10 = pnand %p4172_p6, %p860_p9 }
  0x55   : > { %5913 = sst [smem:[#allocation45_spill]] %s5411_s4  ;;  %s5174_s22 = smov [#allocation5]  }
  0x56   : > { %s5914_s7 = scalar_select %p5413_p10, 1, 0 }
  0x57   : > { %s5915_s30 = scalar_select %p5417_p11, 1, 0 }
  0x58   : > { %p4619_p12 = pneg %p5413_p10  ;;  %s905_s1 = sshll.u32 %s5174_s22, 4  ;;  %s906_s1 = int_to_ptr.vmem [resolvable:$true] %s905_s1 }
  0x59   : > { %s5175_s23 = smov [#allocation8]   ;;  %s4932_s4 = scalar_lea.vmem %s906_s1, 16 }
  0x5a   : > { %s942_s16 = sshll.u32 %s5175_s23, 4  ;;  %p5425_p13 = pnand %p5417_p11, %p4619_p12  ;;  %s943_s16 = int_to_ptr.vmem [resolvable:$true] %s942_s16 }
  0x5b   : > { %p4933_p1 = scmp.ne.s32.totalorder %s906_s1, %s4932_s4  ;;  %s4939_s22 = scalar_lea.vmem %s906_s1, 32 }
  0x5c   : > { %p5431_p0 = pneg %p5425_p13  ;;  %p4940_p5 = scmp.lt.s32.totalorder %s906_s1, %s906_s1 }
  0x5d   : > { %p4941_p6 = scmp.lt.s32.totalorder %s4939_s22, %s4932_s4 }
  0x5e   : > { %p4935_p2 = pnand %p4933_p1, %p5431_p0 }
  0x5f   : > { %p4942_p7 = por %p4941_p6, %p4940_p5 }
  0x60   : > { %p4936_p3 = pneg %p4935_p2 }
  0x62   : > { %p4943_p9 = pnand %p4942_p7, %p4936_p3 }
  0x64   : > { %4946 = shalt.err (!%p4943_p9)
}
  0x65   : > { %s5918_s20 = sld [smem:[#allocation25_spill]]  ;;  %s4958_s23 = scalar_lea.vmem %s943_s16, 64 }
  0x66   : > { %p4959_p12 = scmp.ne.s32.totalorder %s943_s16, %s4958_s23  ;;  %p4966_p11 = scmp.lt.s32.totalorder %s943_s16, %s943_s16 }
  0x67   : > { %p4967_p10 = scmp.lt.s32.totalorder %s4958_s23, %s4958_s23 }
  0x68   : > { %p4961_p8 = pnand %p4959_p12, %p5431_p0 }
  0x69   : > { %p4968_p1 = por %p4967_p10, %p4966_p11 }
  0x6a   : > { %p4962_p4 = pneg %p4961_p8 }
  0x6b   : > { %4625 = dma.hbm_to_vmem [thread:$0]  (!%p5425_p13), %s5918_s20, 16, %s906_s1, [#allocation6]  }
  0x6c   : > { %p4969_p2 = pnand %p4968_p1, %p4962_p4 }
  0x6e   : > { %4972 = shalt.err (!%p4969_p2)
}
  0x6f   : > { %4631 = dma.hbm_to_vmem [thread:$0]  (!%p5425_p13), %s5301_s29, 64, %s943_s16, [#allocation9]  }
  0x70   : > { %s5176_s4 = smov [#allocation2]   ;;  %s5177_s11 = smov [#allocation7]  }
  0x71   : > { %s894_s22 = sshll.u32 %s5176_s4, 4  ;;  %s916_s1 = sshll.u32 %s5177_s11, 4  ;;  %s895_s22 = int_to_ptr.vmem [resolvable:$true] %s894_s22  ;;  %s917_s1 = int_to_ptr.vmem [resolvable:$true] %s916_s1 }
  0x72   : > { %s4984_s20 = scalar_lea.vmem %s895_s22, 16  ;;  %s4991_s2 = scalar_lea.vmem %s895_s22, 32 }
  0x73   : > { %p4985_p3 = scmp.ne.s32.totalorder %s895_s22, %s4984_s20  ;;  %p4992_p6 = scmp.lt.s32.totalorder %s895_s22, %s895_s22 }
  0x74   : > { %p4993_p10 = scmp.lt.s32.totalorder %s4991_s2, %s4984_s20 }
  0x75   : > { %p4987_p5 = pnand %p4985_p3, %p5431_p0 }
  0x76   : > { %p4994_p4 = por %p4993_p10, %p4992_p6 }
  0x77   : > { %p4988_p8 = pneg %p4987_p5 }
  0x79   : > { %p4995_p11 = pnand %p4994_p4, %p4988_p8 }
  0x7b   : > { %4998 = shalt.err (!%p4995_p11)
}
  0x7c   : > { %4622 = dma.hbm_to_vmem [thread:$0]  (!%p5425_p13), %s5261_s12, 16, %s895_s22, [#allocation3]  }
  0x7d   : > { %s5010_s16 = scalar_lea.vmem %s917_s1, 16  ;;  %s5017_s11 = scalar_lea.vmem %s917_s1, 32 }
  0x7e   : > { %p5011_p7 = scmp.ne.s32.totalorder %s917_s1, %s5010_s16  ;;  %p5018_p1 = scmp.lt.s32.totalorder %s917_s1, %s917_s1 }
  0x7f   : > { %p5019_p2 = scmp.lt.s32.totalorder %s5017_s11, %s5010_s16 }
  0x80   : > { %p5013_p9 = pnand %p5011_p7, %p5431_p0 }
  0x81   : > { %p5020_p3 = por %p5019_p2, %p5018_p1 }
  0x82   : > { %p5014_p12 = pneg %p5013_p9 }
  0x84   : > { %p5021_p5 = pnand %p5020_p3, %p5014_p12 }
  0x86   : > { %5024 = shalt.err (!%p5021_p5)
}
  0x87   : > { %4628 = dma.hbm_to_vmem [thread:$0]  (!%p5425_p13), %s5271_s27, 16, %s917_s1, [#allocation6]  }
  0x88   : > { %s5178_s20 = smov [#allocation10]  }
  0x89   : > { %s956_s2 = sshll.u32 %s5178_s20, 4  ;;  %s957_s2 = int_to_ptr.vmem [resolvable:$true] %s956_s2 }
  0x8a   : > { %s5036_s23 = scalar_lea.vmem %s957_s2, 16  ;;  %s5043_s4 = scalar_lea.vmem %s957_s2, 32 }
  0x8b   : > { %p5037_p8 = scmp.ne.s32.totalorder %s957_s2, %s5036_s23  ;;  %p5044_p4 = scmp.lt.s32.totalorder %s957_s2, %s957_s2 }
  0x8c   : > { %p5045_p11 = scmp.lt.s32.totalorder %s5043_s4, %s5036_s23 }
  0x8d   : > { %p5039_p6 = pnand %p5037_p8, %p5431_p0 }
  0x8e   : > { %p5046_p7 = por %p5045_p11, %p5044_p4 }
  0x8f   : > { %p5040_p10 = pneg %p5039_p6 }
  0x91   : > { %p5047_p9 = pnand %p5046_p7, %p5040_p10 }
  0x93   : > { %5050 = shalt.err (!%p5047_p9)
}
  0x94   : > { %4634 = dma.hbm_to_vmem [thread:$0]  (!%p5425_p13), %s5311_s21, 16, %s957_s2, [#allocation9]  }
  0x95   : > { %p5919_p12 = scmp.ne.s32.totalorder %s5914_s7, 0 }
  0x96   : > { %p5920_p1 = scmp.ne.s32.totalorder (!%p5919_p12), %s5915_s30, 0 }
  0x97   : > { %1051 = sbr.rel (%p5919_p12) target bundleno = 3797 (0xed5), region = 152 }
  0x9c   : > { %5102 = dma.done.wait (%p5920_p1), [#allocation3], 16  }
  0x9d   : > { %5104 = vsyncadd (%p5920_p1), [#allocation3], 4294967280 }
  0x9e   : > { %5106 = dma.done.wait (%p5920_p1), [#allocation6], 32  }
  0x9f   : > { %5108 = vsyncadd (%p5920_p1), [#allocation6], 4294967264 }
  0xa0   : > { %5110 = dma.done.wait (%p5920_p1), [#allocation9], 80  }
  0xa1   : > { %5112 = vsyncadd (%p5920_p1), [#allocation9], 4294967216  ;;  %s5921_s5 = sld [smem:[#allocation16_spill]]  ;;  %p1183_p13 = scmp.lt.s32.totalorder %s5131_s15, 1  ;;  %v5179_v0 = vmov 0   ;;  %vm1303_vm0 = vcmask 261120   ;;  %v1243_v35 = vlaneseq }
  0xa2   : > { %s5922_s9 = sld [smem:[#allocation17_spill]]  ;;  %1339 = vmatprep.mubr.bf16.mxu0 %v5179_v0  ;;  %1380 = vmatprep.mubr.bf16.mxu1 %v5179_v0  ;;  %v4739_v1 = vld [vmem:[%s5905_s3 + $0x24] ss:$16 sps:$4 sm:$0xff]   ;;  %v4741_v2 = vld [vmem:[%s5905_s3 + $0x20] ss:$16 sps:$4 sm:$0xff]   ;;  %v5180_v30 = vmov 0.0  }
  0xa3   : > { %s5478_s7 = scalar_select %p1183_p13, %s5131_s15, 1  ;;  %1319 = vmatprep.subr.bf16.mxu0 %v4739_v1  ;;  %v4742_v3 = vld [vmem:[%s5905_s3 + $0x4] ss:$16 sps:$4 sm:$0xff]   ;;  %v4744_v4 = vld [vmem:[%s5905_s3] ss:$16 sps:$4 sm:$0xff]   ;;  %vm5181_vm1 = vmmov 0  }
  0xa4   : > { %1320 = vmatpush1.bf16.msra.mxu0 %v4741_v2  ;;  %v4747_v8 = vld [vmem:[%s5236_s14 + $0x24] ss:$16 sps:$4 sm:$0xff]   ;;  %v4748_v9 = vld [vmem:[%s5905_s3 + $0x2c] ss:$16 sps:$4 sm:$0xff]   ;;  %v4750_v10 = vld [vmem:[%s5905_s3 + $0x28] ss:$16 sps:$4 sm:$0xff]  }
  0xa5   : > { %s5481_s30 = sshll.u32 %s5478_s7, 3  ;;  %1321 = vmatprep.subr.bf16.mxu0 %v4742_v3  ;;  %v4745_v12 = vld [vmem:[%s5236_s14 + $0x20] ss:$16 sps:$4 sm:$0xff]   ;;  %1360 = vmatprep.subr.bf16.mxu1 %v4748_v9  ;;  %v4753_v13 = vld [vmem:[%s5236_s14 + $0x4] ss:$16 sps:$4 sm:$0xff]   ;;  %s5923_s8 = sld [smem:[#allocation22_spill]] }
  0xa6   : > { %s1200_s22 = scalar_lea.vmem %s5201_s13, %s5481_s30  ;;  %s1204_s1 = scalar_lea.vmem %s5206_s17, %s5481_s30  ;;  %1361 = vmatpush1.bf16.msra.mxu1 %v4750_v10  ;;  %v4754_v14 = vld [vmem:[%s5905_s3 + $0xc] ss:$16 sps:$4 sm:$0xff]   ;;  %v4756_v15 = vld [vmem:[%s5905_s3 + $0x8] ss:$16 sps:$4 sm:$0xff]   ;;  %v4751_v20 = vld [vmem:[%s5236_s14] ss:$16 sps:$4 sm:$0xff]  }
  0xa7   : > { %s5485_s26 = scalar_lea.vmem %s5921_s5, %s5481_s30  ;;  %v1223_v16 = vld [vmem:[%s1200_s22] sm:$0xff]  ;;  %1362 = vmatprep.subr.bf16.mxu1 %v4754_v14  ;;  %v4759_v19 = vld [vmem:[%s5236_s14 + $0x2c] ss:$16 sps:$4 sm:$0xff]   ;;  %v4757_v21 = vld [vmem:[%s5236_s14 + $0x28] ss:$16 sps:$4 sm:$0xff]   ;;  %v1244_v36 = vshrl.u32 %v1243_v35, 7 }
  0xa8   : > { %s5490_s0 = scalar_lea.vmem %s5922_s9, %s5481_s30  ;;  %v1221_v5 = vld [vmem:[%s5485_s26] sm:$0xff]  ;;  %1322 = vmatpush1.bf16.msra.mxu0 %v4744_v4  ;;  %v4762_v22 = vld [vmem:[%s5236_s14 + $0xc] ss:$16 sps:$4 sm:$0xff]   ;;  %v4760_v26 = vld [vmem:[%s5236_s14 + $0x8] ss:$16 sps:$4 sm:$0xff]   ;;  %v1546_v29 = vpack.c.bf16 %v1223_v16, %v1223_v16  ;;  %s5924_s16 = sld [smem:[#allocation23_spill]] }
  0xa9   : > { %v1222_v6 = vld [vmem:[%s5490_s0] sm:$0xff]  ;;  %1476 = vmatprep.subr.bf16.mxu0 %v4747_v8  ;;  %v4769_v31 = vld [vmem:[%s5246_s24 + $0x28] ss:$16 sps:$4 sm:$0xff]   ;;  %v4771_v32 = vld [vmem:[%s5246_s24 + $0x2c] ss:$16 sps:$4 sm:$0xff]   ;;  %v5537_v38 = vsub.s32 0, %v1244_v36 }
  0xaa   : > { %v1231_v7 = vadd.f32 %v1222_v6, %v1221_v5  ;;  %v1224_v17 = vld [vmem:[%s1204_s1] sm:$0xff]  ;;  %1363 = vmatpush1.bf16.msra.mxu1 %v4756_v15  ;;  %v4774_v33 = vld [vmem:[%s5246_s24 + $0xc] ss:$16 sps:$4 sm:$0xff]   ;;  %v4772_v34 = vld [vmem:[%s5246_s24 + $0x8] ss:$16 sps:$4 sm:$0xff]   ;;  %v5543_v49 = vsub.s32 1, %v1244_v36 }
  0xab   : > { %v1389_v18 = vadd.f32 %v1224_v17, %v1223_v16  ;;  %1517 = vmatprep.subr.bf16.mxu1 %v4759_v19  ;;  %v4763_v23 = vld [vmem:[%s5246_s24 + $0x20] ss:$16 sps:$4 sm:$0xff]   ;;  %v4765_v24 = vld [vmem:[%s5246_s24 + $0x24] ss:$16 sps:$4 sm:$0xff]   ;;  %v5548_v62 = vsub.s32 2, %v1244_v36  ;;  %vm1774_vm2 = vcmask 1043456  }
  0xac   : > { %v1232_v11 = vpack.c.bf16 %v1231_v7, %v1231_v7  ;;  %v4768_v27 = vld [vmem:[%s5246_s24 + $0x4] ss:$16 sps:$4 sm:$0xff]   ;;  %v4766_v28 = vld [vmem:[%s5246_s24] ss:$16 sps:$4 sm:$0xff]   ;;  %vm1758_vm3 = vcmask 64512   ;;  %s5925_s11 = sld [smem:[#allocation24_spill]] }
  0xad   : > { %v1390_v25 = vpack.c.bf16 %v1389_v18, %v1389_v18  ;;  %v1399_v40 = vld [vmem:[%s5241_s19] sm:$0xf]  ;;  %s5927_s2 = sld [smem:[#allocation26_spill]]  ;;  %vm3025_vm4 = vcmask 130048   ;;  %vm3851_vm5 = vcmask 523264   ;;  %p5945_p2 = scmp.ne.s32.totalorder %s5910_s28, 0 }
  0xae   : > { %4204 = vmatmul.mubr.msk.bf16.vlgmr.msra.gmra.mxu0 %vm1303_vm0, %v1232_v11  ;;  %4205 = vmatmul.mubr.msk.bf16.vlgmr.msra.gmra.mxu1 %vm1303_vm0, %v1232_v11  ;;  %v1241_v41 = vld [vmem:[%s5923_s8] sm:$0xf]  ;;  %v1404_v43 = vrot.slane %v1399_v40, %v5537_v38  ;;  %v1408_v55 = vrot.slane %v1399_v40, %v5543_v49  ;;  %v1412_v2 = vrot.slane %v1399_v40, %v5548_v62  ;;  %v5555_v11 = vsub.s32 3, %v1244_v36  ;;  %s5928_s23 = sld [smem:[#allocation28_spill]] }
  0xaf   : > { %1477 = vmatpush1.bf16.msra.mxu0 %v4745_v12  ;;  %1496 = vmatprep.mubr.bf16.mxu0 %v5179_v0  ;;  %v1246_v45 = vrot.slane %v1241_v41, %v5537_v38  ;;  %v1250_v60 = vrot.slane %v1241_v41, %v5543_v49  ;;  %v1254_v10 = vrot.slane %v1241_v41, %v5548_v62  ;;  %s5929_s4 = sld [smem:[#allocation18_spill]] }
  0xb0   : > { %1478 = vmatprep.subr.bf16.mxu0 %v4753_v13  ;;  %1518 = vmatpush1.bf16.msra.mxu1 %v4757_v21  ;;  %v1416_v15 = vrot.slane %v1399_v40, %v5555_v11  ;;  %v1258_v17 = vrot.slane %v1241_v41, %v5555_v11  ;;  %s5930_s30 = sld [smem:[#allocation19_spill]] }
  0xb1   : > { %1537 = vmatprep.mubr.bf16.mxu1 %v5179_v0  ;;  %1519 = vmatprep.subr.bf16.mxu1 %v4762_v22  ;;  %s5942_s6 = sld [smem:[#allocation37_spill]] }
  0xb2   : > { %s5926_s20 = smov %s5925_s11 }
  0xb3   : > { %1479 = vmatpush1.bf16.msra.mxu0 %v4751_v20 }
  0xb4   : > { %1632 = vmatprep.subr.bf16.mxu0 %v4765_v24  ;;  %1520 = vmatpush1.bf16.msra.mxu1 %v4760_v26  ;;  %v5565_v24 = vld [vmem:[%s5924_s16] sm:$0xf]  ;;  %s5933_s16 = sld [smem:[#allocation20_spill]] }
  0xb5   : > { %1673 = vmatprep.subr.bf16.mxu1 %v4771_v32 }
  0xb6   : > { %4214 = vmatmul.mubr.msk.bf16.vlgmr.msra.gmra.mxu0 %vm1303_vm0, %v1390_v25 }
  0xb7   : > { %1633 = vmatpush1.bf16.msra.mxu0 %v4763_v23  ;;  %1652 = vmatprep.mubr.bf16.mxu0 %v5179_v0 }
  0xb8   : > { %4215 = vmatmul.mubr.msk.bf16.vlgmr.msra.gmra.mxu1 %vm1303_vm0, %v1390_v25  ;;  %1634 = vmatprep.subr.bf16.mxu0 %v4768_v27  ;;  %v1560_v25 = vrot.slane %v5565_v24, %v5537_v38 }
  0xb9   : > { %1693 = vmatprep.mubr.bf16.mxu1 %v5179_v0  ;;  %1674 = vmatpush1.bf16.msra.mxu1 %v4769_v31 }
  0xba   : > { %1675 = vmatprep.subr.bf16.mxu1 %v4774_v33 }
  0xbb   : > { %1635 = vmatpush1.bf16.msra.mxu0 %v4766_v28 }
  0xbc   : > { %4481 = vmatprep.subr.bf16.mxu0 %v5180_v30 }
  0xbd   : > { %1676 = vmatpush1.bf16.msra.mxu1 %v4772_v34 }
  0xbe   : > { %4224 = vmatmul.mubr.msk.bf16.vlgmr.msra.gmra.mxu0 %vm1303_vm0, %v1546_v29  ;;  %4487 = vmatprep.subr.bf16.mxu1 %v5180_v30 }
  0xbf   : > { %4483 = vmatprep.mubr.msk.bf16.mxu0 %vm5181_vm1, %v5180_v30 }
  0xc0   : > { %4225 = vmatmul.mubr.msk.bf16.vlgmr.msra.gmra.mxu1 %vm1303_vm0, %v1546_v29 }
  0xc1   : > { %4489 = vmatprep.mubr.msk.bf16.mxu1 %vm5181_vm1, %v5180_v30 }
 0x16e   : > { %v1341_v37 = vpop.f32.mrf.mxu0  ;;  %v1382_v44 = vpop.f32.mrf.mxu1 }
 0x16f   : > { %v1342_v52 = vadd.f32 %v1341_v37, %v1246_v45  ;;  %v1383_v14 = vadd.f32 %v1382_v44, %v1254_v10 }
 0x170   : > { %v1343_v39 = vpop.f32.mrf.mxu0  ;;  %v1384_v47 = vpop.f32.mrf.mxu1 }
 0x171   : > { %v1702_v59 = vmul.f32 0.35355338, %v1342_v52  ;;  %v1344_v5 = vadd.f32 %v1343_v39, %v1250_v60  ;;  %v1704_v16 = vmul.f32 0.35355338, %v1383_v14  ;;  %v1385_v20 = vadd.f32 %v1384_v47, %v1258_v17 }
 0x172   : > { %v1345_v42 = vpop.f32.mrf.mxu0  ;;  %v1386_v51 = vpop.f32.mrf.mxu1 }
 0x173   : > { %v1706_v4 = vpack.c.bf16 %v1702_v59, %v1702_v59  ;;  %v1703_v9 = vmul.f32 0.35355338, %v1344_v5  ;;  %v1708_v19 = vpack.c.bf16 %v1704_v16, %v1704_v16  ;;  %v1705_v22 = vmul.f32 0.35355338, %v1385_v20  ;;  %v4776_v20 = vld [vmem:[%s5926_s20 + $0x38] sm:$0xff]  }
 0x174   : > { %v1346_v46 = vpop.f32.mrf.mxu0  ;;  %v1387_v56 = vpop.f32.mrf.mxu1 }
 0x175   : > { %v1707_v13 = vpack.c.bf16 %v1703_v9, %v1703_v9  ;;  %v1709_v23 = vpack.c.bf16 %v1705_v22, %v1705_v22  ;;  %v4778_v22 = vld [vmem:[%s5926_s20 + $0x30] sm:$0xff]  }
 0x176   : > { %v1498_v48 = vpop.f32.mrf.mxu0 }
 0x177   : > { %v1499_v50 = vadd.f32 %v1498_v48, %v1404_v43 }
 0x178   : > { %v1500_v53 = vpop.f32.mrf.mxu0  ;;  %v1539_v58 = vpop.f32.mrf.mxu1 }
 0x179   : > { %v1710_v54 = vpack.c.bf16 %v1499_v50, %v1499_v50  ;;  %v1501_v63 = vadd.f32 %v1500_v53, %v1408_v55  ;;  %v1540_v8 = vadd.f32 %v1539_v58, %v1412_v2 }
 0x17a   : > { %v1502_v57 = vpop.f32.mrf.mxu0  ;;  %v1541_v1 = vpop.f32.mrf.mxu1 }
 0x17b   : > { %4482 = vmatpush3.bf16.xpose.msra.mxu0 %v1710_v54  ;;  %v1711_v6 = vpack.c.bf16 %v1501_v63, %v1501_v63  ;;  %v1712_v12 = vpack.c.bf16 %v1540_v8, %v1540_v8  ;;  %v1542_v18 = vadd.f32 %v1541_v1, %v1416_v15 }
 0x17c   : > { %v1503_v61 = vpop.f32.mrf.mxu0  ;;  %4493 = vmatprep.subr.bf16.mxu0 %v5180_v30  ;;  %v1543_v3 = vpop.f32.mrf.mxu1 }
 0x17d   : > { %v1713_v21 = vpack.c.bf16 %v1542_v18, %v1542_v18 }
 0x17e   : > { %v1544_v7 = vpop.f32.mrf.mxu1  ;;  %v1654_v26 = vpop.f32.mrf.mxu0 }
 0x17f   : > { %v1655_v27 = vadd.f32 %v1654_v26, %v1560_v25  ;;  %v4780_v25 = vld [vmem:[%s5926_s20 + $0x28] sm:$0xff]   ;;  %v4781_v26 = vld [vmem:[%s5926_s20 + $0x60] sm:$0xff]  }
 0x180   : > { %v5569_v28 = vpop.f32.mrf.mxu0  ;;  %v1695_v14 = vpop.f32.mrf.mxu1 }
 0x181   : > { %v1714_v29 = vpack.c.bf16 %v1655_v27, %v1655_v27  ;;  %v4782_v27 = vld [vmem:[%s5926_s20 + $0x20] sm:$0xff]  }
 0x182   : > { %4484 = vmatmul.mubr.bf16.vlgmr.msra.gmra.mxu0 %v1706_v4  ;;  %v1658_v31 = vpop.f32.mrf.mxu0  ;;  %v1697_v16 = vpop.f32.mrf.mxu1 }
 0x183   : > { %4494 = vmatpush3.bf16.xpose.msra.mxu0 %v1711_v6  ;;  %4495 = vmatprep.mubr.msk.bf16.mxu0 %vm5181_vm1, %v5180_v30  ;;  %v1776_v32 = vsel %vm1774_vm2, %v1714_v29, 0  ;;  %v4783_v29 = vld [vmem:[%s5926_s20 + $0x58] sm:$0xff]  }
 0x184   : > { %4505 = vmatprep.subr.bf16.mxu0 %v5180_v30  ;;  %v1659_v33 = vpop.f32.mrf.mxu0  ;;  %4488 = vmatpush3.bf16.msra.mxu1 %v1776_v32  ;;  %v1699_v17 = vpop.f32.mrf.mxu1  ;;  %v4785_v31 = vld [vmem:[%s5926_s20 + $0x18] sm:$0xff]  }
 0x185   : > { %4499 = vmatprep.subr.bf16.mxu1 %v5180_v30  ;;  %v1564_v33 = vrot.slane %v5565_v24, %v5543_v49  ;;  %v4803_v17 = vld [vmem:[%s5926_s20 + $0xc8] sm:$0xff]  }
 0x186   : > { %v1700_v18 = vpop.f32.mrf.mxu1 }
 0x187   : > { %v4804_v18 = vld [vmem:[%s5926_s20 + $0x88] sm:$0xff]  }
 0x18a   : > { %4496 = vmatmul.mubr.bf16.vlgmr.msra.gmra.mxu0 %v1707_v13 }
 0x18b   : > { %4506 = vmatpush3.bf16.xpose.msra.mxu0 %v1712_v12  ;;  %4507 = vmatprep.mubr.msk.bf16.mxu0 %vm5181_vm1, %v5180_v30 }
 0x18c   : > { %4517 = vmatprep.subr.bf16.mxu0 %v5180_v30 }
 0x192   : > { %4508 = vmatmul.mubr.bf16.vlgmr.msra.gmra.mxu0 %v1708_v19  ;;  %v4775_v19 = vld [vmem:[%s5925_s11 + $0x78] sm:$0xff]  }
 0x193   : > { %4518 = vmatpush3.bf16.xpose.msra.mxu0 %v1713_v21  ;;  %4519 = vmatprep.mubr.msk.bf16.mxu0 %vm5181_vm1, %v5180_v30  ;;  %v4777_v21 = vld [vmem:[%s5926_s20 + $0x70] sm:$0xff]  }
 0x194   : > { %4369 = vmatprep.subr.bf16.mxu0 %v4775_v19  ;;  %v4805_v19 = vld [vmem:[%s5926_s20 + $0xc0] sm:$0xff]  }
 0x19a   : > { %4520 = vmatmul.mubr.bf16.vlgmr.msra.gmra.mxu0 %v1709_v23  ;;  %v4779_v23 = vld [vmem:[%s5926_s20 + $0x68] sm:$0xff]  }
 0x19b   : > { %4370 = vmatpush3.bf16.msra.mxu0 %v4776_v20  ;;  %v4806_v20 = vld [vmem:[%s5926_s20 + $0x80] sm:$0xff]  }
 0x19c   : > { %4371 = vmatprep.subr.bf16.mxu0 %v4777_v21 }
 0x19f   : > { %4372 = vmatpush3.bf16.msra.mxu0 %v4778_v22 }
 0x1a0   : > { %4373 = vmatprep.subr.bf16.mxu0 %v4779_v23 }
 0x1a3   : > { %4374 = vmatpush3.bf16.msra.mxu0 %v4780_v25 }
 0x1a4   : > { %4375 = vmatprep.subr.bf16.mxu0 %v4781_v26 }
 0x1a7   : > { %4376 = vmatpush3.bf16.msra.mxu0 %v4782_v27 }
 0x1a8   : > { %4377 = vmatprep.subr.bf16.mxu0 %v4783_v29 }
 0x1ab   : > { %4378 = vmatpush3.bf16.msra.mxu0 %v4785_v31 }
 0x242   : > { %v1752_v34 = vpop.f32.mrf.mxu0 }
 0x243   : > { %v1759_v35 = vsel %vm1758_vm3, %v1752_v34, -inf }
 0x244   : > { %1760 = vmax.xlane.f32.xlu0 %v1759_v35  ;;  %v4485_v36 = vpop.f32.mrf.mxu0  ;;  %v1657_v35 = vadd.f32 %v5569_v28, %v1564_v33 }
 0x245   : > { %v1568_v36 = vrot.slane %v5565_v24, %v5548_v62 }
 0x246   : > { %v1755_v37 = vpop.f32.mrf.mxu0 }
 0x248   : > { %v4486_v39 = vpop.f32.mrf.mxu0 }
 0x249   : > { %v1715_v39 = vpack.c.bf16 %v1657_v35, %v1657_v35 }
 0x24a   : > { %v1852_v40 = vpop.f32.mrf.mxu0 }
 0x24b   : > { %v1858_v41 = vsel %vm1758_vm3, %v1852_v40, -inf }
 0x24c   : > { %1859 = vmax.xlane.f32.xlu0 %v1858_v41  ;;  %v4497_v42 = vpop.f32.mrf.mxu0 }
 0x24d   : > { %v1696_v42 = vadd.f32 %v1695_v14, %v1568_v36  ;;  %v4800_v14 = vld [vmem:[%s5926_s20 + $0x98] sm:$0xff]  }
 0x24e   : > { %v1855_v43 = vpop.f32.mrf.mxu0 }
 0x250   : > { %v4498_v44 = vpop.f32.mrf.mxu0 }
 0x251   : > { %v1874_v44 = vsel %vm1774_vm2, %v1715_v39, 0 }
 0x252   : > { %v1950_v45 = vpop.f32.mrf.mxu0 }
 0x253   : > { %v1956_v46 = vsel %vm1758_vm3, %v1950_v45, -inf }
 0x254   : > { %1957 = vmax.xlane.f32.xlu1 %v1956_v46  ;;  %v4509_v47 = vpop.f32.mrf.mxu0  ;;  %v1572_v46 = vrot.slane %v5565_v24, %v5555_v11 }
 0x256   : > { %v1953_v48 = vpop.f32.mrf.mxu0 }
 0x258   : > { %v4510_v50 = vpop.f32.mrf.mxu0 }
 0x25a   : > { %v2048_v51 = vpop.f32.mrf.mxu0 }
 0x25b   : > { %v2054_v52 = vsel %vm1758_vm3, %v2048_v51, -inf }
 0x25c   : > { %2055 = vmax.xlane.f32.xlu1 %v2054_v52  ;;  %v4521_v53 = vpop.f32.mrf.mxu0  ;;  %v1698_v52 = vadd.f32 %v1697_v16, %v1572_v46  ;;  %v4802_v16 = vld [vmem:[%s5926_s20 + $0x90] sm:$0xff]  }
 0x25e   : > { %v2051_v54 = vpop.f32.mrf.mxu0 }
 0x25f   : > { %v1717_v54 = vpack.c.bf16 %v1698_v52, %v1698_v52 }
 0x260   : > { %v4522_v55 = vpop.f32.mrf.mxu0 }
 0x2cd   : > { %v1761_v56 = vpop.xlane.xlu0 %1760 }
 0x2ce   : > { %v1762_v57 = vsub.f32 %v1752_v34, %v1761_v56  ;;  %v4784_v56 = vld [vmem:[%s5926_s20 + $0xf8] sm:$0xff]  }
 0x2d0   : > { %v1763_v58 = vmul.f32 1.442695, %v1762_v57  ;;  %v2070_v57 = vsel %vm1774_vm2, %v1717_v54, 0 }
 0x2d2   : > { %4881 = vpow2.f32 %v1763_v58 }
 0x2d5   : > { %v1860_v59 = vpop.xlane.xlu0 %1859 }
 0x2d6   : > { %v1861_v60 = vsub.f32 %v1852_v40, %v1860_v59 }
 0x2d8   : > { %v1862_v61 = vmul.f32 1.442695, %v1861_v60  ;;  %v4786_v60 = vld [vmem:[%s5926_s20 + $0xb8] sm:$0xff]  }
 0x2da   : > { %4883 = vpow2.f32 %v1862_v61 }
 0x2dd   : > { %v1958_v63 = vpop.xlane.xlu1 %1957 }
 0x2de   : > { %v1959_v1 = vsub.f32 %v1950_v45, %v1958_v63  ;;  %v1716_v45 = vpack.c.bf16 %v1696_v42, %v1696_v42  ;;  %v4787_v63 = vld [vmem:[%s5926_s20 + $0x50] sm:$0xff]  }
 0x2df   : > { %v4882_v2 = vpop.eup %4881  ;;  %4379 = vmatprep.subr.bf16.mxu0 %v4787_v63 }
 0x2e0   : > { %v1960_v3 = vmul.f32 1.442695, %v1959_v1  ;;  %v1765_v4 = vsel %vm1758_vm3, %v4882_v2, 0.0  ;;  %v1972_v50 = vsel %vm1774_vm2, %v1716_v45, 0  ;;  %v4788_v1 = vld [vmem:[%s5926_s20 + $0xf0] sm:$0xff]  }
 0x2e1   : > { %1766 = vadd.xlane.f32.xlu0 %v1765_v4  ;;  %v4791_v4 = vld [vmem:[%s5926_s20 + $0x48] sm:$0xff]  }
 0x2e2   : > { %4885 = vpow2.f32 %v1960_v3  ;;  %v4790_v3 = vld [vmem:[%s5926_s20 + $0xb0] sm:$0xff]  }
 0x2e5   : > { %v2056_v5 = vpop.xlane.xlu1 %2055 }
 0x2e6   : > { %v2057_v6 = vsub.f32 %v2048_v51, %v2056_v5  ;;  %v4792_v5 = vld [vmem:[%s5926_s20 + $0xe8] sm:$0xff]  }
 0x2e7   : > { %v4884_v7 = vpop.eup %4883 }
 0x2e8   : > { %v2058_v8 = vmul.f32 1.442695, %v2057_v6  ;;  %v1864_v9 = vsel %vm1758_vm3, %v4884_v7, 0.0  ;;  %v4793_v6 = vld [vmem:[%s5926_s20 + $0x8] sm:$0xff]  }
 0x2e9   : > { %1865 = vadd.xlane.f32.xlu1 %v1864_v9  ;;  %v4796_v9 = vld [vmem:[%s5926_s20 + $0xe0] sm:$0xff]  }
 0x2ea   : > { %4887 = vpow2.f32 %v2058_v8  ;;  %v4795_v8 = vld [vmem:[%s5926_s20 + $0x40] sm:$0xff]  }
 0x2ef   : > { %v5579_v10 = vpop.eup %4885 }
 0x2f0   : > { %v1962_v12 = vsel %vm1758_vm3, %v5579_v10, 0.0 }
 0x2f1   : > { %1963 = vadd.xlane.f32.xlu0 %v1962_v12  ;;  %v4798_v12 = vld [vmem:[%s5926_s20 + $0xa0] sm:$0xff]  }
 0x2f7   : > { %v5583_v13 = vpop.eup %4887 }
 0x2f8   : > { %v2060_v15 = vsel %vm1758_vm3, %v5583_v13, 0.0 }
 0x2f9   : > { %2061 = vadd.xlane.f32.xlu1 %v2060_v15  ;;  %v4801_v15 = vld [vmem:[%s5926_s20 + $0xd0] sm:$0xff]  }
 0x36a   : > { %v1767_v32 = vpop.xlane.xlu0 %1766 }
 0x36b   : > { %4889 = vrcp.f32 %v1767_v32 }
 0x372   : > { %v1866_v34 = vpop.xlane.xlu1 %1865 }
 0x373   : > { %4891 = vrcp.f32 %v1866_v34 }
 0x378   : > { %v4890_v37 = vpop.eup %4889 }
 0x379   : > { %v1769_v40 = vmul.f32 %v4890_v37, %v4882_v2  ;;  %v4789_v2 = vld [vmem:[%s5926_s20 + $0x10] sm:$0xff]  }
 0x37a   : > { %v1964_v41 = vpop.xlane.xlu0 %1963  ;;  %4380 = vmatpush3.bf16.msra.mxu0 %v4789_v2 }
 0x37b   : > { %4893 = vrcp.f32 %v1964_v41  ;;  %v1770_v43 = vpack.c.bf16 %v1769_v40, %v1769_v40  ;;  %4381 = vmatprep.subr.bf16.mxu0 %v4791_v4  ;;  %v4809_v4 = vld [vmem:[%s5927_s2 + $0x24] ss:$16 sps:$4 sm:$0xff]  }
 0x37d   : > { %4490 = vmatmul.mubr.msk.bf16.vlgmr.msra.gmra.mxu1 %vm1758_vm3, %v1770_v43 }
 0x37e   : > { %4500 = vmatpush3.bf16.msra.mxu1 %v1874_v44  ;;  %4501 = vmatprep.mubr.msk.bf16.mxu1 %vm5181_vm1, %v5180_v30 }
 0x37f   : > { %4511 = vmatprep.subr.bf16.mxu1 %v5180_v30  ;;  %4382 = vmatpush3.bf16.msra.mxu0 %v4793_v6  ;;  %v4812_v6 = vld [vmem:[%s5927_s2 + $0x2c] ss:$16 sps:$4 sm:$0xff]  }
 0x380   : > { %v4892_v28 = vpop.eup %4891  ;;  %4383 = vmatprep.subr.bf16.mxu0 %v4795_v8  ;;  %v4818_v8 = vld [vmem:[%s5927_s2 + $0xc] ss:$16 sps:$4 sm:$0xff]  }
 0x381   : > { %v1868_v47 = vmul.f32 %v4892_v28, %v4884_v7  ;;  %v4794_v7 = vld [vmem:[%s5926_s20 + $0xa8] sm:$0xff]  }
 0x382   : > { %v2062_v48 = vpop.xlane.xlu1 %2061 }
 0x383   : > { %4895 = vrcp.f32 %v2062_v48  ;;  %v1869_v51 = vpack.c.bf16 %v1868_v47, %v1868_v47 }
 0x385   : > { %4502 = vmatmul.mubr.msk.bf16.vlgmr.msra.gmra.mxu1 %vm1758_vm3, %v1869_v51 }
 0x386   : > { %4512 = vmatpush3.bf16.msra.mxu1 %v1972_v50  ;;  %4513 = vmatprep.mubr.msk.bf16.mxu1 %vm5181_vm1, %v5180_v30  ;;  %v4230_v50 = vld [vmem:[#allocation2] ss:$0 sm:$0xff] }
 0x387   : > { %4523 = vmatprep.subr.bf16.mxu1 %v5180_v30 }
 0x388   : > { %v4894_v53 = vpop.eup %4893 }
 0x389   : > { %v1966_v24 = vmul.f32 %v4894_v53, %v5579_v10  ;;  %v4797_v10 = vld [vmem:[%s5926_s20] sm:$0xff]  }
 0x38a   : > { %4384 = vmatpush3.bf16.msra.mxu0 %v4797_v10  ;;  %v4816_v10 = vld [vmem:[%s5927_s2 + $0x8] ss:$16 sps:$4 sm:$0xff]  }
 0x38b   : > { %v1967_v55 = vpack.c.bf16 %v1966_v24, %v1966_v24  ;;  %2577 = vmatprep.subr.bf16.mxu0 %v4809_v4 }
 0x38d   : > { %4514 = vmatmul.mubr.msk.bf16.vlgmr.msra.gmra.mxu1 %vm1758_vm3, %v1967_v55 }
 0x38e   : > { %4524 = vmatpush3.bf16.msra.mxu1 %v2070_v57  ;;  %4525 = vmatprep.mubr.msk.bf16.mxu1 %vm5181_vm1, %v5180_v30  ;;  %v4919_v57 = vld [vmem:[%s5485_s26] sm:$0xff]  ;;  %s5659_s26 = sshll.u32 %s5478_s7, 4  ;;  %s5931_s7 = sld [smem:[#allocation30_spill]] }
 0x38f   : > { %4391 = vmatprep.subr.bf16.mxu1 %v4784_v56  ;;  %s1209_s22 = scalar_lea.vmem %s5929_s4, %s5659_s26  ;;  %s1214_s1 = scalar_lea.vmem %s5930_s30, %s5659_s26 }
 0x390   : > { %v4896_v58 = vpop.eup %4895  ;;  %s1219_s11 = scalar_lea.vmem %s5933_s16, %s5659_s26  ;;  %s5934_s4 = sld [smem:[#allocation29_spill]] }
 0x391   : > { %v2064_v59 = vmul.f32 %v4896_v58, %v5583_v13  ;;  %v4799_v13 = vld [vmem:[%s5926_s20 + $0xd8] sm:$0xff]   ;;  %s5935_s30 = sld [smem:[#allocation27_spill]] }
 0x392   : > { %s5936_s26 = sld [smem:[#allocation31_spill]] }
 0x393   : > { %v2065_v61 = vpack.c.bf16 %v2064_v59, %v2064_v59  ;;  %s5940_s16 = sld [smem:[#allocation33_spill]] }
 0x395   : > { %4526 = vmatmul.mubr.msk.bf16.vlgmr.msra.gmra.mxu1 %vm1758_vm3, %v2065_v61 }
 0x396   : > { %4392 = vmatpush3.bf16.msra.mxu1 %v4786_v60 }
 0x397   : > { %4393 = vmatprep.subr.bf16.mxu1 %v4788_v1 }
 0x39a   : > { %4394 = vmatpush3.bf16.msra.mxu1 %v4790_v3  ;;  %v4807_v3 = vld [vmem:[%s5927_s2 + $0x20] ss:$16 sps:$4 sm:$0xff]  }
 0x39b   : > { %4395 = vmatprep.subr.bf16.mxu1 %v4792_v5  ;;  %v4810_v5 = vld [vmem:[%s5927_s2 + $0x28] ss:$16 sps:$4 sm:$0xff]  }
 0x39e   : > { %4396 = vmatpush3.bf16.msra.mxu1 %v4794_v7  ;;  %v4815_v7 = vld [vmem:[%s5927_s2 + $0x4] ss:$16 sps:$4 sm:$0xff]  }
 0x39f   : > { %4397 = vmatprep.subr.bf16.mxu1 %v4796_v9  ;;  %v4813_v9 = vld [vmem:[%s5927_s2] ss:$16 sps:$4 sm:$0xff]  }
 0x3a2   : > { %4398 = vmatpush3.bf16.msra.mxu1 %v4798_v12  ;;  %v4821_v12 = vld [vmem:[%s5928_s23 + $0x24] ss:$16 sps:$4 sm:$0xff]  }
 0x3a3   : > { %4399 = vmatprep.subr.bf16.mxu1 %v4799_v13  ;;  %v4827_v13 = vld [vmem:[%s5928_s23 + $0x2c] ss:$16 sps:$4 sm:$0xff]  }
 0x3a6   : > { %4400 = vmatpush3.bf16.msra.mxu1 %v4800_v14 }
 0x3a7   : > { %4401 = vmatprep.subr.bf16.mxu1 %v4801_v15 }
 0x3aa   : > { %4402 = vmatpush3.bf16.msra.mxu1 %v4802_v16 }
 0x3ab   : > { %4403 = vmatprep.subr.bf16.mxu1 %v4803_v17 }
 0x3ae   : > { %4404 = vmatpush3.bf16.msra.mxu1 %v4804_v18  ;;  %v4263_v18 = vld [vmem:[#allocation5] ss:$0 sm:$0xff] }
 0x3af   : > { %4405 = vmatprep.subr.bf16.mxu1 %v4805_v19 }
 0x3b2   : > { %4406 = vmatpush3.bf16.msra.mxu1 %v4806_v20  ;;  %v4264_v20 = vld [vmem:[#allocation7] ss:$0 sm:$0xff] }
 0x3b3   : > { %2618 = vmatprep.subr.bf16.mxu1 %v4812_v6 }
 0x43d   : > { %v1812_v21 = vpop.f32.mrf.mxu1 }
 0x43e   : > { %v2112_v29 = vpack.c.bf16 %v1812_v21, %v1812_v21 }
 0x43f   : > { %v4491_v22 = vpop.f32.mrf.mxu1 }
 0x441   : > { %v1815_v23 = vpop.f32.mrf.mxu1 }
 0x442   : > { %v4920_v23 = vld [vmem:[%s5490_s0] sm:$0xff]  ;;  %s5932_s0 = smov %s5931_s7 }
 0x443   : > { %v4492_v25 = vpop.f32.mrf.mxu1 }
 0x445   : > { %v1910_v26 = vpop.f32.mrf.mxu1 }
 0x446   : > { %v2113_v27 = vpack.c.bf16 %v1910_v26, %v1910_v26  ;;  %v4819_v26 = vld [vmem:[%s5928_s23 + $0x20] ss:$16 sps:$4 sm:$0xff]  }
 0x447   : > { %v4503_v31 = vpop.f32.mrf.mxu1 }
 0x448   : > { %2411 = vmatprep.mubr.bf16.mxu0 %v2113_v27  ;;  %v1225_v27 = vld [vmem:[%s1209_s22] sm:$0xff] }
 0x449   : > { %v1913_v32 = vpop.f32.mrf.mxu1  ;;  %2412 = vmatmul.mubr.bf16.vlgmr.msra.gmra.mxu0 %v2112_v29  ;;  %v1226_v29 = vld [vmem:[%s1209_s22 + $0x8] sm:$0xff]  ;;  %v1227_v31 = vld [vmem:[%s1214_s1] sm:$0xff]  ;;  %s5937_s22 = sld [smem:[#allocation34_spill]] }
 0x44a   : > { %2597 = vmatprep.mubr.bf16.mxu0 %v5179_v0  ;;  %2578 = vmatpush1.bf16.msra.mxu0 %v4807_v3  ;;  %v1228_v32 = vld [vmem:[%s1214_s1 + $0x8] sm:$0xff]  ;;  %s5938_s1 = sld [smem:[#allocation36_spill]] }
 0x44b   : > { %v4504_v33 = vpop.f32.mrf.mxu1  ;;  %2579 = vmatprep.subr.bf16.mxu0 %v4815_v7 }
 0x44d   : > { %v2008_v34 = vpop.f32.mrf.mxu1 }
 0x44e   : > { %v2114_v41 = vpack.c.bf16 %v2008_v34, %v2008_v34  ;;  %2580 = vmatpush1.bf16.msra.mxu0 %v4813_v9  ;;  %v4824_v34 = vld [vmem:[%s5928_s23 + $0x4] ss:$16 sps:$4 sm:$0xff]  }
 0x44f   : > { %v4515_v35 = vpop.f32.mrf.mxu1  ;;  %2735 = vmatprep.subr.bf16.mxu0 %v4821_v12 }
 0x450   : > { %v4825_v35 = vld [vmem:[%s5928_s23 + $0x28] ss:$16 sps:$4 sm:$0xff]  }
 0x451   : > { %v2011_v36 = vpop.f32.mrf.mxu1 }
 0x452   : > { %v4830_v36 = vld [vmem:[%s5928_s23 + $0xc] ss:$16 sps:$4 sm:$0xff]  }
 0x453   : > { %v4516_v37 = vpop.f32.mrf.mxu1 }
 0x454   : > { %v2647_v37 = vadd.f32 %v1227_v31, %v1225_v27 }
 0x455   : > { %v2106_v39 = vpop.f32.mrf.mxu1 }
 0x456   : > { %v2115_v40 = vpack.c.bf16 %v2106_v39, %v2106_v39  ;;  %v2648_v39 = vadd.f32 %v1228_v32, %v1226_v29 }
 0x457   : > { %v4527_v42 = vpop.f32.mrf.mxu1 }
 0x458   : > { %2451 = vmatprep.mubr.bf16.mxu1 %v2115_v40  ;;  %v4822_v40 = vld [vmem:[%s5928_s23] ss:$16 sps:$4 sm:$0xff]   ;;  %v2649_v42 = vpack.c.bf16 %v2648_v39, %v2647_v37 }
 0x459   : > { %v2109_v43 = vpop.f32.mrf.mxu1  ;;  %2452 = vmatmul.mubr.bf16.vlgmr.msra.gmra.mxu1 %v2114_v41  ;;  %v4828_v41 = vld [vmem:[%s5928_s23 + $0x8] ss:$16 sps:$4 sm:$0xff]  }
 0x45a   : > { %2638 = vmatprep.mubr.bf16.mxu1 %v5179_v0  ;;  %2619 = vmatpush1.bf16.msra.mxu1 %v4810_v5  ;;  %v4833_v43 = vld [vmem:[%s5931_s7 + $0x24] ss:$16 sps:$4 sm:$0xff]   ;;  %s5939_s7 = sld [smem:[#allocation32_spill]] }
 0x45b   : > { %v4528_v44 = vpop.f32.mrf.mxu1  ;;  %2620 = vmatprep.subr.bf16.mxu1 %v4818_v8 }
 0x45c   : > { %v4831_v44 = vld [vmem:[%s5932_s0 + $0x20] ss:$16 sps:$4 sm:$0xff]  }
 0x45e   : > { %2621 = vmatpush1.bf16.msra.mxu1 %v4816_v10 }
 0x45f   : > { %2778 = vmatprep.subr.bf16.mxu1 %v4827_v13 }
 0x509   : > { %v4385_v45 = vpop.f32.mrf.mxu0 }
 0x50b   : > { %v4386_v28 = vpop.f32.mrf.mxu0 }
 0x50c   : > { %v4387_v48 = vadd.f32 %v4386_v28, %v4385_v45  ;;  %v4836_v45 = vld [vmem:[%s5932_s0 + $0x4] ss:$16 sps:$4 sm:$0xff]   ;;  %v4834_v28 = vld [vmem:[%s5932_s0] ss:$16 sps:$4 sm:$0xff]  }
 0x50d   : > { %v4388_v46 = vpop.f32.mrf.mxu0 }
 0x50e   : > { %v2414_v53 = vadd.f32 %v4387_v48, %v4230_v50  ;;  %v1229_v46 = vld [vmem:[%s1219_s11] sm:$0xff]  ;;  %v4839_v50 = vld [vmem:[%s5932_s0 + $0x2c] ss:$16 sps:$4 sm:$0xff]  }
 0x50f   : > { %v4389_v47 = vpop.f32.mrf.mxu0 }
 0x510   : > { %v1230_v47 = vld [vmem:[%s1219_s11 + $0x8] sm:$0xff]  ;;  %s5941_s11 = sld [smem:[#allocation35_spill]] }
 0x511   : > { %v2809_v48 = vpack.c.bf16 %v1230_v47, %v1229_v46 }
 0x519   : > { %v4407_v51 = vpop.f32.mrf.mxu1 }
 0x51b   : > { %v4408_v52 = vpop.f32.mrf.mxu1 }
 0x51c   : > { %v4409_v54 = vadd.f32 %v4408_v52, %v4407_v51  ;;  %v4840_v51 = vld [vmem:[%s5932_s0 + $0x8] ss:$16 sps:$4 sm:$0xff]   ;;  %v4842_v52 = vld [vmem:[%s5932_s0 + $0xc] ss:$16 sps:$4 sm:$0xff]  }
 0x51d   : > { %v4410_v24 = vpop.f32.mrf.mxu1 }
 0x51e   : > { %v2454_v55 = vadd.f32 %v4409_v54, %v2414_v53 }
 0x51f   : > { %v4411_v56 = vpop.f32.mrf.mxu1 }
 0x520   : > { %v2459_v58 = vadd.f32 %v4919_v57, %v2454_v55 }
 0x522   : > { %v2462_v59 = vsel %vm1303_vm0, %v2459_v58, 0.0 }
 0x523   : > { %2463 = vadd.xlane.f32.xlu0 %v2462_v59 }
 0x5ac   : > { %v2464_v60 = vpop.xlane.xlu0 %2463 }
 0x5ad   : > { %v2466_v61 = vmul.f32 0.03125, %v2464_v60  ;;  %v2658_v60 = vld [vmem:[%s5934_s4] sm:$0xf]  ;;  %s5943_s4 = sld [smem:[#allocation38_spill]] }
 0x5ae   : > { %v2667_v10 = vrot.slane %v2658_v60, %v5543_v49 }
 0x5af   : > { %v2467_v63 = vsub.f32 %v2459_v58, %v2466_v61  ;;  %v2500_v61 = vld [vmem:[%s5935_s30] sm:$0xf]  ;;  %s5944_s30 = sld [smem:[#allocation39_spill]] }
 0x5b0   : > { %v2509_v13 = vrot.slane %v2500_v61, %v5543_v49  ;;  %v2517_v37 = vrot.slane %v2500_v61, %v5555_v11 }
 0x5b1   : > { %v2468_v1 = vmul.f32 %v2467_v63, %v2467_v63 }
 0x5b3   : > { %v2469_v2 = vsel %vm1303_vm0, %v2468_v1, 0.0  ;;  %v2663_v1 = vrot.slane %v2658_v60, %v5537_v38 }
 0x5b4   : > { %2470 = vadd.xlane.f32.xlu1 %v2469_v2  ;;  %v2505_v2 = vrot.slane %v2500_v61, %v5537_v38 }
 0x63d   : > { %v2471_v14 = vpop.xlane.xlu1 %2470 }
 0x63e   : > { %v2472_v15 = vmul.f32 0.03125, %v2471_v14 }
 0x640   : > { %v2473_v16 = vadd.f32 1e-05, %v2472_v15 }
 0x642   : > { %4897 = vrsqrt.f32 %v2473_v16 }
 0x64f   : > { %v4898_v17 = vpop.eup %4897 }
 0x650   : > { %v2475_v19 = vmul.f32 %v4898_v17, %v2467_v63 }
 0x652   : > { %v2482_v21 = vmul.f32 %v4263_v18, %v2475_v19 }
 0x654   : > { %v5663_v22 = vadd.f32 %v4264_v20, %v2482_v21  ;;  %v2671_v21 = vrot.slane %v2658_v60, %v5548_v62 }
 0x656   : > { %v2490_v25 = vadd.f32 %v4920_v23, %v5663_v22  ;;  %v2513_v23 = vrot.slane %v2500_v61, %v5548_v62 }
 0x658   : > { %v2491_v33 = vpack.c.bf16 %v2490_v25, %v2490_v25 }
 0x65a   : > { %4273 = vmatmul.mubr.msk.bf16.vlgmr.msra.gmra.mxu0 %vm1303_vm0, %v2491_v33  ;;  %4274 = vmatmul.mubr.msk.bf16.vlgmr.msra.gmra.mxu1 %vm1303_vm0, %v2491_v33  ;;  %v2675_v33 = vrot.slane %v2658_v60, %v5555_v11 }
 0x65b   : > { %2736 = vmatpush1.bf16.msra.mxu0 %v4819_v26  ;;  %2755 = vmatprep.mubr.bf16.mxu0 %v5179_v0 }
 0x65c   : > { %2737 = vmatprep.subr.bf16.mxu0 %v4824_v34  ;;  %2779 = vmatpush1.bf16.msra.mxu1 %v4825_v35 }
 0x65d   : > { %2780 = vmatprep.subr.bf16.mxu1 %v4830_v36  ;;  %2798 = vmatprep.mubr.bf16.mxu1 %v5179_v0 }
 0x65f   : > { %2738 = vmatpush1.bf16.msra.mxu0 %v4822_v40 }
 0x660   : > { %2781 = vmatpush1.bf16.msra.mxu1 %v4828_v41  ;;  %2895 = vmatprep.subr.bf16.mxu0 %v4833_v43 }
 0x661   : > { %2938 = vmatprep.subr.bf16.mxu1 %v4839_v50 }
 0x662   : > { %4283 = vmatmul.mubr.msk.bf16.vlgmr.msra.gmra.mxu0 %vm1303_vm0, %v2649_v42 }
 0x663   : > { %4284 = vmatmul.mubr.msk.bf16.vlgmr.msra.gmra.mxu1 %vm1303_vm0, %v2649_v42  ;;  %2915 = vmatprep.mubr.bf16.mxu0 %v5179_v0 }
 0x664   : > { %2958 = vmatprep.mubr.bf16.mxu1 %v5179_v0  ;;  %2896 = vmatpush1.bf16.msra.mxu0 %v4831_v44  ;;  %v4837_v0 = vld [vmem:[%s5932_s0 + $0x28] ss:$16 sps:$4 sm:$0xff]  }
 0x665   : > { %2897 = vmatprep.subr.bf16.mxu0 %v4836_v45  ;;  %2939 = vmatpush1.bf16.msra.mxu1 %v4837_v0 }
 0x666   : > { %2940 = vmatprep.subr.bf16.mxu1 %v4842_v52 }
 0x668   : > { %2898 = vmatpush1.bf16.msra.mxu0 %v4834_v28  ;;  %v5720_v28 = vld [vmem:[#allocation8] sm:$0xf] }
 0x669   : > { %4529 = vmatprep.subr.bf16.mxu0 %v5180_v30  ;;  %2941 = vmatpush1.bf16.msra.mxu1 %v4840_v51  ;;  %v2823_v46 = vrot.slane %v5720_v28, %v5537_v38 }
 0x66a   : > { %4535 = vmatprep.subr.bf16.mxu1 %v5180_v30 }
 0x66b   : > { %4293 = vmatmul.mubr.msk.bf16.vlgmr.msra.gmra.mxu0 %vm1303_vm0, %v2809_v48 }
 0x66c   : > { %4531 = vmatprep.mubr.msk.bf16.mxu0 %vm5181_vm1, %v5180_v30  ;;  %4294 = vmatmul.mubr.msk.bf16.vlgmr.msra.gmra.mxu1 %vm1303_vm0, %v2809_v48 }
 0x66d   : > { %4537 = vmatprep.mubr.msk.bf16.mxu1 %vm5181_vm1, %v5180_v30 }
 0x71a   : > { %v2599_v53 = vpop.f32.mrf.mxu0  ;;  %v2640_v54 = vpop.f32.mrf.mxu1 }
 0x71b   : > { %v2600_v7 = vadd.f32 %v2599_v53, %v2505_v2  ;;  %v2641_v31 = vadd.f32 %v2640_v54, %v2513_v23 }
 0x71c   : > { %v2601_v24 = vpop.f32.mrf.mxu0  ;;  %v2642_v55 = vpop.f32.mrf.mxu1 }
 0x71d   : > { %v2969_v12 = vmul.f32 0.35355338, %v2600_v7  ;;  %v2602_v18 = vadd.f32 %v2601_v24, %v2509_v13  ;;  %v2971_v36 = vmul.f32 0.35355338, %v2641_v31  ;;  %v2643_v42 = vadd.f32 %v2642_v55, %v2517_v37  ;;  %v4845_v37 = vld [vmem:[%s5936_s26 + $0x70] sm:$0xff]  }
 0x71e   : > { %v2603_v56 = vpop.f32.mrf.mxu0  ;;  %v2644_v57 = vpop.f32.mrf.mxu1 }
 0x71f   : > { %v2973_v17 = vpack.c.bf16 %v2969_v12, %v2969_v12  ;;  %v2970_v25 = vmul.f32 0.35355338, %v2602_v18  ;;  %v2975_v41 = vpack.c.bf16 %v2971_v36, %v2971_v36  ;;  %v2972_v44 = vmul.f32 0.35355338, %v2643_v42  ;;  %v4844_v36 = vld [vmem:[%s5936_s26 + $0x38] sm:$0xff]   ;;  %v4849_v42 = vld [vmem:[%s5936_s26 + $0x60] sm:$0xff]  }
 0x720   : > { %v2604_v58 = vpop.f32.mrf.mxu0  ;;  %v2645_v59 = vpop.f32.mrf.mxu1 }
 0x721   : > { %v2974_v32 = vpack.c.bf16 %v2970_v25, %v2970_v25  ;;  %v2976_v45 = vpack.c.bf16 %v2972_v44, %v2972_v44  ;;  %v4851_v44 = vld [vmem:[%s5936_s26 + $0x58] sm:$0xff]  }
 0x722   : > { %v2757_v63 = vpop.f32.mrf.mxu0 }
 0x723   : > { %v2758_v5 = vadd.f32 %v2757_v63, %v2663_v1  ;;  %v2800_v14 = vpop.f32.mrf.mxu1 }
 0x724   : > { %v2759_v3 = vpop.f32.mrf.mxu0  ;;  %v2801_v27 = vadd.f32 %v2800_v14, %v2671_v21 }
 0x725   : > { %v2760_v16 = vadd.f32 %v2759_v3, %v2667_v10  ;;  %v2802_v19 = vpop.f32.mrf.mxu1 }
 0x726   : > { %v2761_v4 = vpop.f32.mrf.mxu0  ;;  %v2803_v39 = vadd.f32 %v2802_v19, %v2675_v33 }
 0x727   : > { %v2762_v6 = vadd.f32 %v2761_v4, %v2663_v1  ;;  %v2804_v26 = vpop.f32.mrf.mxu1 }
 0x728   : > { %v2763_v9 = vpop.f32.mrf.mxu0  ;;  %v2805_v29 = vadd.f32 %v2804_v26, %v2671_v21 }
 0x729   : > { %v2977_v8 = vpack.c.bf16 %v2762_v6, %v2758_v5  ;;  %v2764_v15 = vadd.f32 %v2763_v9, %v2667_v10  ;;  %v2806_v35 = vpop.f32.mrf.mxu1 }
 0x72a   : > { %v2979_v34 = vpack.c.bf16 %v2805_v29, %v2801_v27  ;;  %v2807_v40 = vadd.f32 %v2806_v35, %v2675_v33  ;;  %v4843_v35 = vld [vmem:[%s5936_s26 + $0x78] sm:$0xff]  }
 0x72b   : > { %4530 = vmatpush3.bf16.xpose.msra.mxu0 %v2977_v8  ;;  %v2978_v20 = vpack.c.bf16 %v2764_v15, %v2760_v16  ;;  %v2917_v47 = vpop.f32.mrf.mxu0 }
 0x72c   : > { %4541 = vmatprep.subr.bf16.mxu0 %v5180_v30  ;;  %v2980_v43 = vpack.c.bf16 %v2807_v40, %v2803_v39  ;;  %v2918_v0 = vadd.f32 %v2917_v47, %v2823_v46  ;;  %v4846_v39 = vld [vmem:[%s5936_s26 + $0x30] sm:$0xff]   ;;  %v4847_v40 = vld [vmem:[%s5936_s26 + $0x68] sm:$0xff]  }
 0x72d   : > { %v5724_v48 = vpop.f32.mrf.mxu0 }
 0x72f   : > { %v2921_v50 = vpop.f32.mrf.mxu0 }
 0x730   : > { %v2922_v51 = vadd.f32 %v2921_v50, %v2823_v46  ;;  %v2960_v50 = vpop.f32.mrf.mxu1 }
 0x731   : > { %v5727_v53 = vpop.f32.mrf.mxu0 }
 0x732   : > { %4532 = vmatmul.mubr.bf16.vlgmr.msra.gmra.mxu0 %v2973_v17  ;;  %v2981_v52 = vpack.c.bf16 %v2922_v51, %v2918_v0  ;;  %v2827_v0 = vrot.slane %v5720_v28, %v5543_v49 }
 0x733   : > { %4542 = vmatpush3.bf16.xpose.msra.mxu0 %v2978_v20  ;;  %4543 = vmatprep.mubr.msk.bf16.mxu0 %vm5181_vm1, %v5180_v30 }
 0x734   : > { %4553 = vmatprep.subr.bf16.mxu0 %v5180_v30  ;;  %4536 = vmatpush3.bf16.msra.mxu1 %v2981_v52  ;;  %v2920_v52 = vadd.f32 %v5724_v48, %v2827_v0 }
 0x735   : > { %4547 = vmatprep.subr.bf16.mxu1 %v5180_v30 }
 0x73a   : > { %4544 = vmatmul.mubr.bf16.vlgmr.msra.gmra.mxu0 %v2974_v32 }
 0x73b   : > { %4554 = vmatpush3.bf16.xpose.msra.mxu0 %v2979_v34  ;;  %4555 = vmatprep.mubr.msk.bf16.mxu0 %vm5181_vm1, %v5180_v30 }
 0x73c   : > { %4565 = vmatprep.subr.bf16.mxu0 %v5180_v30 }
 0x742   : > { %4556 = vmatmul.mubr.bf16.vlgmr.msra.gmra.mxu0 %v2975_v41  ;;  %v4848_v41 = vld [vmem:[%s5936_s26 + $0x28] sm:$0xff]  }
 0x743   : > { %4566 = vmatpush3.bf16.xpose.msra.mxu0 %v2980_v43  ;;  %4567 = vmatprep.mubr.msk.bf16.mxu0 %vm5181_vm1, %v5180_v30  ;;  %v4850_v43 = vld [vmem:[%s5936_s26 + $0x20] sm:$0xff]  }
 0x744   : > { %4429 = vmatprep.subr.bf16.mxu0 %v4843_v35  ;;  %v4873_v35 = vld [vmem:[%s5936_s26 + $0xc0] sm:$0xff]  }
 0x74a   : > { %4568 = vmatmul.mubr.bf16.vlgmr.msra.gmra.mxu0 %v2976_v45  ;;  %v4853_v45 = vld [vmem:[%s5936_s26 + $0x18] sm:$0xff]  }
 0x74b   : > { %4430 = vmatpush3.bf16.msra.mxu0 %v4844_v36  ;;  %v4874_v36 = vld [vmem:[%s5936_s26 + $0x80] sm:$0xff]  }
 0x74c   : > { %4431 = vmatprep.subr.bf16.mxu0 %v4845_v37 }
 0x74f   : > { %4432 = vmatpush3.bf16.msra.mxu0 %v4846_v39 }
 0x750   : > { %4433 = vmatprep.subr.bf16.mxu0 %v4847_v40 }
 0x753   : > { %4434 = vmatpush3.bf16.msra.mxu0 %v4848_v41 }
 0x754   : > { %4435 = vmatprep.subr.bf16.mxu0 %v4849_v42 }
 0x757   : > { %4436 = vmatpush3.bf16.msra.mxu0 %v4850_v43 }
 0x758   : > { %4437 = vmatprep.subr.bf16.mxu0 %v4851_v44 }
 0x75b   : > { %4438 = vmatpush3.bf16.msra.mxu0 %v4853_v45 }
 0x7f2   : > { %v3019_v54 = vpop.f32.mrf.mxu0 }
 0x7f3   : > { %v3026_v24 = vsel %vm3025_vm4, %v3019_v54, -inf }
 0x7f4   : > { %3027 = vmax.xlane.f32.xlu0 %v3026_v24  ;;  %v4533_v55 = vpop.f32.mrf.mxu0  ;;  %v2962_v24 = vpop.f32.mrf.mxu1 }
 0x7f6   : > { %v3022_v56 = vpop.f32.mrf.mxu0 }
 0x7f7   : > { %v2831_v56 = vrot.slane %v5720_v28, %v5548_v62 }
 0x7f8   : > { %v4534_v38 = vpop.f32.mrf.mxu0 }
 0x7fa   : > { %v3115_v57 = vpop.f32.mrf.mxu0 }
 0x7fb   : > { %v3121_v58 = vsel %vm3025_vm4, %v3115_v57, -inf }
 0x7fc   : > { %3122 = vmax.xlane.f32.xlu1 %v3121_v58  ;;  %v4545_v59 = vpop.f32.mrf.mxu0 }
 0x7fd   : > { %v2964_v59 = vpop.f32.mrf.mxu1 }
 0x7fe   : > { %v3118_v60 = vpop.f32.mrf.mxu0  ;;  %v2965_v49 = vadd.f32 %v2964_v59, %v2831_v56 }
 0x7ff   : > { %v2961_v60 = vadd.f32 %v2960_v50, %v2831_v56 }
 0x800   : > { %v4546_v61 = vpop.f32.mrf.mxu0 }
 0x801   : > { %v2983_v61 = vpack.c.bf16 %v2965_v49, %v2961_v60 }
 0x802   : > { %v3210_v63 = vpop.f32.mrf.mxu0 }
 0x803   : > { %v3216_v1 = vsel %vm3025_vm4, %v3210_v63, -inf }
 0x804   : > { %3217 = vmax.xlane.f32.xlu0 %v3216_v1  ;;  %v4557_v2 = vpop.f32.mrf.mxu0  ;;  %v2835_v1 = vrot.slane %v5720_v28, %v5555_v11  ;;  %v4852_v11 = vld [vmem:[%s5936_s26 + $0xf8] sm:$0xff]  }
 0x805   : > { %v2966_v2 = vpop.f32.mrf.mxu1 }
 0x806   : > { %v3213_v3 = vpop.f32.mrf.mxu0 }
 0x808   : > { %v4558_v4 = vpop.f32.mrf.mxu0 }
 0x809   : > { %v2963_v4 = vadd.f32 %v2962_v24, %v2835_v1 }
 0x80a   : > { %v3305_v5 = vpop.f32.mrf.mxu0 }
 0x80b   : > { %v3311_v6 = vsel %vm3025_vm4, %v3305_v5, -inf }
 0x80c   : > { %3312 = vmax.xlane.f32.xlu1 %v3311_v6  ;;  %v4569_v7 = vpop.f32.mrf.mxu0 }
 0x80e   : > { %v3308_v8 = vpop.f32.mrf.mxu0 }
 0x810   : > { %v4570_v9 = vpop.f32.mrf.mxu0 }
 0x87d   : > { %v3028_v10 = vpop.xlane.xlu0 %3027 }
 0x87e   : > { %v3029_v12 = vsub.f32 %v3019_v54, %v3028_v10  ;;  %v2924_v54 = vadd.f32 %v5727_v53, %v2827_v0  ;;  %v4854_v10 = vld [vmem:[%s5936_s26 + $0xb8] sm:$0xff]  }
 0x880   : > { %v3030_v13 = vmul.f32 1.442695, %v3029_v12  ;;  %v2982_v58 = vpack.c.bf16 %v2924_v54, %v2920_v52 }
 0x882   : > { %4899 = vpow2.f32 %v3030_v13  ;;  %v4855_v13 = vld [vmem:[%s5936_s26 + $0x50] sm:$0xff]  }
 0x883   : > { %4439 = vmatprep.subr.bf16.mxu0 %v4855_v13  ;;  %v4878_v13 = vld [vmem:[%s5938_s1 + $0x10] sm:$0xff]  }
 0x885   : > { %v3123_v14 = vpop.xlane.xlu1 %3122 }
 0x886   : > { %v3124_v15 = vsub.f32 %v3115_v57, %v3123_v14  ;;  %v4856_v14 = vld [vmem:[%s5936_s26 + $0xf0] sm:$0xff]  }
 0x888   : > { %v3125_v16 = vmul.f32 1.442695, %v3124_v15  ;;  %v4857_v15 = vld [vmem:[%s5936_s26 + $0x10] sm:$0xff]  }
 0x889   : > { %4440 = vmatpush3.bf16.msra.mxu0 %v4857_v15 }
 0x88a   : > { %4901 = vpow2.f32 %v3125_v16  ;;  %v4858_v16 = vld [vmem:[%s5936_s26 + $0xb0] sm:$0xff]  }
 0x88d   : > { %v3218_v17 = vpop.xlane.xlu0 %3217 }
 0x88e   : > { %v3219_v18 = vsub.f32 %v3210_v63, %v3218_v17  ;;  %v4859_v17 = vld [vmem:[%s5936_s26 + $0x48] sm:$0xff]  }
 0x88f   : > { %v4900_v19 = vpop.eup %4899  ;;  %4441 = vmatprep.subr.bf16.mxu0 %v4859_v17 }
 0x890   : > { %v3220_v20 = vmul.f32 1.442695, %v3219_v18  ;;  %v3032_v21 = vsel %vm3025_vm4, %v4900_v19, 0.0  ;;  %v4860_v18 = vld [vmem:[%s5936_s26 + $0xe8] sm:$0xff]  }
 0x891   : > { %3033 = vadd.xlane.f32.xlu0 %v3032_v21  ;;  %v4863_v21 = vld [vmem:[%s5936_s26 + $0x40] sm:$0xff]  }
 0x892   : > { %4903 = vpow2.f32 %v3220_v20  ;;  %v4862_v20 = vld [vmem:[%s5936_s26 + $0xa8] sm:$0xff]  }
 0x895   : > { %v3313_v23 = vpop.xlane.xlu1 %3312 }
 0x896   : > { %v3314_v25 = vsub.f32 %v3305_v5, %v3313_v23  ;;  %v2967_v5 = vadd.f32 %v2966_v2, %v2835_v1  ;;  %v4864_v23 = vld [vmem:[%s5936_s26 + $0xe0] sm:$0xff]  }
 0x897   : > { %v4902_v26 = vpop.eup %4901 }
 0x898   : > { %v3315_v27 = vmul.f32 1.442695, %v3314_v25  ;;  %v3127_v29 = vsel %vm3025_vm4, %v4902_v26, 0.0  ;;  %v2984_v28 = vpack.c.bf16 %v2967_v5, %v2963_v4  ;;  %v4865_v25 = vld [vmem:[%s5936_s26] sm:$0xff]  }
 0x899   : > { %3128 = vadd.xlane.f32.xlu1 %v3127_v29  ;;  %v4868_v29 = vld [vmem:[%s5936_s26 + $0x98] sm:$0xff]  }
 0x89a   : > { %4905 = vpow2.f32 %v3315_v27  ;;  %v4867_v27 = vld [vmem:[%s5936_s26 + $0xd8] sm:$0xff]  }
 0x89f   : > { %v5735_v31 = vpop.eup %4903 }
 0x8a0   : > { %v3222_v32 = vsel %vm3025_vm4, %v5735_v31, 0.0 }
 0x8a1   : > { %3223 = vadd.xlane.f32.xlu0 %v3222_v32  ;;  %v4870_v32 = vld [vmem:[%s5936_s26 + $0x90] sm:$0xff]  }
 0x8a7   : > { %v5739_v33 = vpop.eup %4905 }
 0x8a8   : > { %v3317_v34 = vsel %vm3025_vm4, %v5739_v33, 0.0 }
 0x8a9   : > { %3318 = vadd.xlane.f32.xlu1 %v3317_v34  ;;  %v4872_v34 = vld [vmem:[%s5936_s26 + $0x88] sm:$0xff]  }
 0x91a   : > { %v3034_v46 = vpop.xlane.xlu0 %3033 }
 0x91b   : > { %4907 = vrcp.f32 %v3034_v46 }
 0x922   : > { %v3129_v47 = vpop.xlane.xlu1 %3128 }
 0x923   : > { %4909 = vrcp.f32 %v3129_v47 }
 0x928   : > { %v4908_v51 = vpop.eup %4907 }
 0x929   : > { %v3036_v55 = vmul.f32 %v4908_v51, %v4900_v19  ;;  %v4861_v19 = vld [vmem:[%s5936_s26 + $0x8] sm:$0xff]  }
 0x92a   : > { %v3224_v38 = vpop.xlane.xlu0 %3223  ;;  %4442 = vmatpush3.bf16.msra.mxu0 %v4861_v19 }
 0x92b   : > { %4911 = vrcp.f32 %v3224_v38  ;;  %v3037_v57 = vpack.c.bf16 %v3036_v55, %v3036_v55  ;;  %4443 = vmatprep.subr.bf16.mxu0 %v4863_v21 }
 0x92d   : > { %4538 = vmatmul.mubr.msk.bf16.vlgmr.msra.gmra.mxu1 %vm3025_vm4, %v3037_v57 }
 0x92e   : > { %4548 = vmatpush3.bf16.msra.mxu1 %v2982_v58  ;;  %4549 = vmatprep.mubr.msk.bf16.mxu1 %vm5181_vm1, %v5180_v30 }
 0x92f   : > { %4559 = vmatprep.subr.bf16.mxu1 %v5180_v30  ;;  %4444 = vmatpush3.bf16.msra.mxu0 %v4865_v25 }
 0x930   : > { %v4910_v48 = vpop.eup %4909  ;;  %4577 = vmatprep.subr.bf16.mxu0 %v5180_v30 }
 0x931   : > { %v3131_v53 = vmul.f32 %v4910_v48, %v4902_v26  ;;  %v4866_v26 = vld [vmem:[%s5936_s26 + $0xa0] sm:$0xff]  }
 0x932   : > { %v3319_v62 = vpop.xlane.xlu1 %3318 }
 0x933   : > { %4913 = vrcp.f32 %v3319_v62  ;;  %v3132_v63 = vpack.c.bf16 %v3131_v53, %v3131_v53  ;;  %v4299_v53 = vld [vmem:[#allocation10] ss:$0 sm:$0xff] }
 0x935   : > { %4550 = vmatmul.mubr.msk.bf16.vlgmr.msra.gmra.mxu1 %vm3025_vm4, %v3132_v63 }
 0x936   : > { %4560 = vmatpush3.bf16.msra.mxu1 %v2983_v61  ;;  %4561 = vmatprep.mubr.msk.bf16.mxu1 %vm5181_vm1, %v5180_v30 }
 0x937   : > { %4571 = vmatprep.subr.bf16.mxu1 %v5180_v30 }
 0x938   : > { %v4912_v3 = vpop.eup %4911 }
 0x939   : > { %v3226_v6 = vmul.f32 %v4912_v3, %v5735_v31  ;;  %v4869_v31 = vld [vmem:[%s5936_s26 + $0xd0] sm:$0xff]  }
 0x93b   : > { %v3227_v7 = vpack.c.bf16 %v3226_v6, %v3226_v6 }
 0x93d   : > { %4562 = vmatmul.mubr.msk.bf16.vlgmr.msra.gmra.mxu1 %vm3025_vm4, %v3227_v7 }
 0x93e   : > { %4572 = vmatpush3.bf16.msra.mxu1 %v2984_v28  ;;  %4573 = vmatprep.mubr.msk.bf16.mxu1 %vm5181_vm1, %v5180_v30 }
 0x93f   : > { %4451 = vmatprep.subr.bf16.mxu1 %v4852_v11 }
 0x940   : > { %v4914_v8 = vpop.eup %4913 }
 0x941   : > { %v3321_v9 = vmul.f32 %v4914_v8, %v5739_v33  ;;  %v4871_v33 = vld [vmem:[%s5936_s26 + $0xc8] sm:$0xff]  }
 0x943   : > { %v3322_v12 = vpack.c.bf16 %v3321_v9, %v3321_v9 }
 0x945   : > { %4574 = vmatmul.mubr.msk.bf16.vlgmr.msra.gmra.mxu1 %vm3025_vm4, %v3322_v12  ;;  %v4876_v12 = vld [vmem:[%s5937_s22] sm:$0xff]  }
 0x946   : > { %4452 = vmatpush3.bf16.msra.mxu1 %v4854_v10  ;;  %v4875_v10 = vld [vmem:[%s5937_s22 + $0x8] sm:$0xff]  }
 0x947   : > { %4453 = vmatprep.subr.bf16.mxu1 %v4856_v14 }
 0x94a   : > { %4454 = vmatpush3.bf16.msra.mxu1 %v4858_v16 }
 0x94b   : > { %4455 = vmatprep.subr.bf16.mxu1 %v4860_v18  ;;  %v4332_v18 = vld [vmem:[%s5939_s7] ss:$0 sm:$0xff]  ;;  %s1180_s7 = sand.u32 1, %s5123_s10  }
 0x94c   : > { %s3927_s3 = scalar_lea.sflag [#allocation4], %s1180_s7 }
 0x94e   : > { %4456 = vmatpush3.bf16.msra.mxu1 %v4862_v20  ;;  %v4333_v20 = vld [vmem:[%s5940_s16] ss:$0 sm:$0xff]  ;;  %s4185_s16 = sshll.u32 %s1180_s7, 3 }
 0x94f   : > { %4457 = vmatprep.subr.bf16.mxu1 %v4864_v23  ;;  %s1182_s0 = scalar_lea.vmem [#allocation11], %s4185_s16 }
 0x952   : > { %4458 = vmatpush3.bf16.msra.mxu1 %v4866_v26  ;;  %v4879_v26 = vld [vmem:[%s5938_s1 + $0x8] sm:$0xff]  }
 0x953   : > { %4459 = vmatprep.subr.bf16.mxu1 %v4867_v27  ;;  %v4880_v27 = vld [vmem:[%s5938_s1] sm:$0xff]  }
 0x956   : > { %4460 = vmatpush3.bf16.msra.mxu1 %v4868_v29  ;;  %v4334_v29 = vld [vmem:[%s5941_s11] ss:$0 sm:$0xff]  ;;  %s4347_s11 = sshll.u32 %s5131_s15, 7 }
 0x957   : > { %4461 = vmatprep.subr.bf16.mxu1 %v4869_v31  ;;  %s3939_s2 = scalar_lea.hbm %s5944_s30, %s4347_s11 }
 0x95a   : > { %4462 = vmatpush3.bf16.msra.mxu1 %v4870_v32 }
 0x95b   : > { %4463 = vmatprep.subr.bf16.mxu1 %v4871_v33 }
 0x95e   : > { %4464 = vmatpush3.bf16.msra.mxu1 %v4872_v34 }
 0x95f   : > { %4465 = vmatprep.subr.bf16.mxu1 %v4873_v35 }
 0x962   : > { %4466 = vmatpush3.bf16.msra.mxu1 %v4874_v36 }
 0x963   : > { %4585 = vmatprep.subr.bf16.mxu1 %v5180_v30 }
 0x9ed   : > { %v3075_v37 = vpop.f32.mrf.mxu1 }
 0x9ee   : > { %v3366_v44 = vpack.c.bf16 %v3075_v37, %v3075_v37 }
 0x9ef   : > { %v4539_v39 = vpop.f32.mrf.mxu1 }
 0x9f0   : > { %v4338_v39 = vld [vmem:[%s5942_s6] ss:$0 sm:$0xff]  ;;  %s5182_s6 = smov [#allocation11]  }
 0x9f1   : > { %v3078_v40 = vpop.f32.mrf.mxu1  ;;  %s5055_s8 = sshll.u32 %s5182_s6, 4  ;;  %s5056_s8 = int_to_ptr.vmem [resolvable:$false] %s5055_s8 }
 0x9f2   : > { %s5057_s9 = scalar_lea.vmem %s5056_s8, 256 }
 0x9f3   : > { %v4540_v41 = vpop.f32.mrf.mxu1 }
 0x9f5   : > { %v3170_v42 = vpop.f32.mrf.mxu1 }
 0x9f6   : > { %v3367_v43 = vpack.c.bf16 %v3170_v42, %v3170_v42 }
 0x9f7   : > { %v4551_v45 = vpop.f32.mrf.mxu1 }
 0x9f8   : > { %3665 = vmatprep.mubr.bf16.mxu0 %v3367_v43 }
 0x9f9   : > { %v3173_v46 = vpop.f32.mrf.mxu1  ;;  %3666 = vmatmul.mubr.bf16.vlgmr.msra.gmra.mxu0 %v3366_v44 }
 0x9fa   : > { %4581 = vmatprep.mubr.msk.bf16.mxu0 %vm5181_vm1, %v5180_v30  ;;  %4578 = vmatpush3.bf16.msra.mxu0 %v4875_v10 }
 0x9fb   : > { %v4552_v47 = vpop.f32.mrf.mxu1  ;;  %4579 = vmatprep.subr.bf16.mxu0 %v5180_v30 }
 0x9fd   : > { %v3265_v0 = vpop.f32.mrf.mxu1 }
 0x9fe   : > { %v3368_v55 = vpack.c.bf16 %v3265_v0, %v3265_v0  ;;  %4580 = vmatpush3.bf16.msra.mxu0 %v4876_v12 }
 0x9ff   : > { %v4563_v50 = vpop.f32.mrf.mxu1 }
 0xa01   : > { %v3268_v51 = vpop.f32.mrf.mxu1 }
 0xa03   : > { %v4564_v52 = vpop.f32.mrf.mxu1 }
 0xa05   : > { %v3360_v54 = vpop.f32.mrf.mxu1 }
 0xa06   : > { %v3369_v24 = vpack.c.bf16 %v3360_v54, %v3360_v54 }
 0xa07   : > { %v4575_v56 = vpop.f32.mrf.mxu1 }
 0xa08   : > { %3705 = vmatprep.mubr.bf16.mxu1 %v3369_v24  ;;  %v4344_v56 = vld [vmem:[%s5346_s25] ss:$0 sm:$0xff] }
 0xa09   : > { %v3363_v38 = vpop.f32.mrf.mxu1  ;;  %3706 = vmatmul.mubr.bf16.vlgmr.msra.gmra.mxu1 %v3368_v55 }
 0xa0a   : > { %4593 = vmatprep.mubr.msk.bf16.mxu1 %vm5181_vm1, %v5180_v30 }
 0xa0b   : > { %v4576_v57 = vpop.f32.mrf.mxu1 }
 0xa0c   : > { %v4345_v57 = vld [vmem:[%s5943_s4] ss:$0 sm:$0xff] }
 0xab9   : > { %v4445_v58 = vpop.f32.mrf.mxu0 }
 0xabb   : > { %v4446_v59 = vpop.f32.mrf.mxu0 }
 0xabc   : > { %v4447_v48 = vadd.f32 %v4446_v59, %v4445_v58 }
 0xabd   : > { %v4448_v60 = vpop.f32.mrf.mxu0 }
 0xabe   : > { %v3668_v63 = vadd.f32 %v4447_v48, %v4299_v53 }
 0xabf   : > { %v4449_v49 = vpop.f32.mrf.mxu0 }
 0xac9   : > { %v4467_v61 = vpop.f32.mrf.mxu1 }
 0xacb   : > { %v4468_v62 = vpop.f32.mrf.mxu1 }
 0xacc   : > { %v4469_v1 = vadd.f32 %v4468_v62, %v4467_v61 }
 0xacd   : > { %v4470_v2 = vpop.f32.mrf.mxu1 }
 0xace   : > { %v3708_v3 = vadd.f32 %v4469_v1, %v3668_v63 }
 0xacf   : > { %v4471_v4 = vpop.f32.mrf.mxu1 }
 0xad0   : > { %v3713_v5 = vadd.f32 %v3708_v3, %v5663_v22  ;;  %v4877_v22 = vld [vmem:[%s5938_s1 + $0x18] sm:$0xff]   ;;  %s3941_s1 = sshll.u32 %s1182_s0, 4  ;;  %s3942_s1 = int_to_ptr.vmem [resolvable:$true] %s3941_s1 }
 0xad1   : > { %4586 = vmatpush3.bf16.msra.mxu1 %v4877_v22  ;;  %s5051_s5 = scalar_lea.vmem %s3942_s1, 128  ;;  %p5058_p8 = scmp.lt.s32.totalorder %s3942_s1, %s5056_s8 }
 0xad2   : > { %v3716_v6 = vsel %vm1303_vm0, %v3713_v5, 0.0  ;;  %4587 = vmatprep.subr.bf16.mxu1 %v5180_v30  ;;  %p5052_p0 = scmp.ne.s32.totalorder %s3942_s1, %s5051_s5  ;;  %p5059_p6 = scmp.lt.s32.totalorder %s5057_s9, %s5051_s5 }
 0xad3   : > { %3717 = vadd.xlane.f32.xlu0 %v3716_v6 }
 0xad4   : > { %p5053_p3 = pnand %p5052_p0, %p5945_p2  ;;  %p5060_p10 = por %p5059_p6, %p5058_p8 }
 0xad5   : > { %4588 = vmatpush3.bf16.msra.mxu1 %v4878_v13 }
 0xad6   : > { %4589 = vmatprep.subr.bf16.mxu1 %v5180_v30  ;;  %p5054_p5 = pneg %p5053_p3 }
 0xad8   : > { %p5061_p4 = pnand %p5060_p10, %p5054_p5 }
 0xad9   : > { %4590 = vmatpush3.bf16.msra.mxu1 %v4879_v26 }
 0xada   : > { %4591 = vmatprep.subr.bf16.mxu1 %v5180_v30 }
 0xadd   : > { %4592 = vmatpush3.bf16.msra.mxu1 %v4880_v27 }
 0xb5c   : > { %v3718_v7 = vpop.xlane.xlu0 %3717 }
 0xb5d   : > { %v3719_v11 = vmul.f32 0.03125, %v3718_v7 }
 0xb5f   : > { %v3720_v28 = vsub.f32 %v3713_v5, %v3719_v11 }
 0xb61   : > { %v3721_v8 = vmul.f32 %v3720_v28, %v3720_v28 }
 0xb63   : > { %v3722_v9 = vsel %vm1303_vm0, %v3721_v8, 0.0 }
 0xb64   : > { %3723 = vadd.xlane.f32.xlu1 %v3722_v9 }
 0xbed   : > { %v3724_v14 = vpop.xlane.xlu1 %3723 }
 0xbee   : > { %v3725_v15 = vmul.f32 0.03125, %v3724_v14 }
 0xbf0   : > { %v3726_v16 = vadd.f32 1e-05, %v3725_v15 }
 0xbf2   : > { %4915 = vrsqrt.f32 %v3726_v16 }
 0xbff   : > { %v4916_v17 = vpop.eup %4915 }
 0xc00   : > { %v3728_v19 = vmul.f32 %v4916_v17, %v3720_v28 }
 0xc02   : > { %v3735_v21 = vmul.f32 %v4332_v18, %v3728_v19 }
 0xc04   : > { %v3742_v23 = vadd.f32 %v4333_v20, %v3735_v21 }
 0xc06   : > { %v3743_v25 = vpack.c.bf16 %v3742_v23, %v3742_v23 }
 0xc08   : > { %4582 = vmatmul.mubr.msk.bf16.vlgmr.msra.gmra.mxu0 %vm1303_vm0, %v3743_v25 }
 0xcc8   : > { %v3804_v31 = vpop.f32.mrf.mxu0 }
 0xcc9   : > { %v3805_v32 = vadd.f32 %v4334_v29, %v3804_v31 }
 0xcca   : > { %v4583_v33 = vpop.f32.mrf.mxu0 }
 0xccb   : > { %v3810_v34 = vmax.f32 %v3805_v32, 0.0 }
 0xccc   : > { %v3807_v35 = vpop.f32.mrf.mxu0 }
 0xccd   : > { %v3811_v36 = vpack.c.bf16 %v3810_v34, %v3810_v34 }
 0xcce   : > { %v4584_v37 = vpop.f32.mrf.mxu0 }
 0xccf   : > { %4594 = vmatmul.mubr.msk.bf16.vlgmr.msra.gmra.mxu1 %vm3851_vm5, %v3811_v36 }
 0xd8f   : > { %v3889_v40 = vpop.f32.mrf.mxu1 }
 0xd90   : > { %v3890_v41 = vadd.f32 %v4338_v39, %v3889_v40 }
 0xd91   : > { %v4595_v42 = vpop.f32.mrf.mxu1 }
 0xd92   : > { %v3895_v43 = vadd.f32 %v3890_v41, %v3742_v23 }
 0xd93   : > { %v3892_v44 = vpop.f32.mrf.mxu1 }
 0xd94   : > { %v3898_v30 = vsel %vm1303_vm0, %v3895_v43, 0.0 }
 0xd95   : > { %3899 = vadd.xlane.f32.xlu0 %v3898_v30  ;;  %v4596_v45 = vpop.f32.mrf.mxu1 }
 0xe1e   : > { %v3900_v46 = vpop.xlane.xlu0 %3899 }
 0xe1f   : > { %v3901_v47 = vmul.f32 0.03125, %v3900_v46 }
 0xe21   : > { %v3902_v0 = vsub.f32 %v3895_v43, %v3901_v47 }
 0xe23   : > { %v3903_v50 = vmul.f32 %v3902_v0, %v3902_v0 }
 0xe25   : > { %v3904_v51 = vsel %vm1303_vm0, %v3903_v50, 0.0 }
 0xe26   : > { %3905 = vadd.xlane.f32.xlu1 %v3904_v51 }
 0xeaf   : > { %v3906_v52 = vpop.xlane.xlu1 %3905 }
 0xeb0   : > { %v3907_v54 = vmul.f32 0.03125, %v3906_v52 }
 0xeb2   : > { %v3908_v24 = vadd.f32 1e-05, %v3907_v54 }
 0xeb4   : > { %4917 = vrsqrt.f32 %v3908_v24 }
 0xec1   : > { %v4918_v55 = vpop.eup %4917 }
 0xec2   : > { %v3910_v38 = vmul.f32 %v4918_v55, %v3902_v0 }
 0xec4   : > { %v3917_v58 = vmul.f32 %v4344_v56, %v3910_v38 }
 0xec6   : > { %v3924_v59 = vadd.f32 %v4345_v57, %v3917_v58 }
 0xec8   : > { %3925 = vst.msk [vmem:[%s1182_s0] sm:$0xff] %vm1303_vm0, %v3924_v59 }
 0xec9   : > { %5064 = shalt.err (!%p5061_p4)
}
 0xeca   : > { %s5065_s15 = scalar_lea.hbm %s3939_s2, 128  ;;  %s5069_s0 = scalar_lea.hbm %s5944_s30, 256 }
 0xecb   : > { %p5066_p11 = scmp.ne.s32.totalorder %s3939_s2, %s5065_s15  ;;  %p5070_p12 = scmp.lt.s32.totalorder %s3939_s2, %s5944_s30 }
 0xecc   : > { %p5071_p1 = scmp.lt.s32.totalorder %s5069_s0, %s5065_s15 }
 0xecd   : > { %p5067_p7 = pnand %p5066_p11, %p5945_p2 }
 0xece   : > { %p5072_p13 = por %p5071_p1, %p5070_p12 }
 0xecf   : > { %p5068_p9 = pneg %p5067_p7 }
 0xed1   : > { %p5073_p0 = pnand %p5072_p13, %p5068_p9 }
 0xed3   : > { %5076 = shalt.err (!%p5073_p0)
}
 0xed4   : > { %4617 = dma.vmem_to_hbm [thread:$0]  (%p5945_p2), %s3942_s1, 128, %s3939_s2, %s3927_s3  }
 0xed5 PF: > { %s5946_s5 = sld [smem:[#allocation40_spill]]  ;;  %p4649_p3 = scmp.ge.s32.totalorder %s5139_s18, 2 }
 0xed6   : > { %s5947_s9 = sld [smem:[#allocation44_spill]] }
 0xedb   : > { %s3953_s8 = sand.u32 1, %s5946_s5  }
 0xedc   : > { %p5948_p5 = scmp.ne.s32.totalorder %s5947_s9, 0  ;;  %s3954_s6 = scalar_lea.sflag [#allocation4], %s3953_s8 }
 0xede   : > { %p4636_p8 = pnand %p4649_p3, %p5948_p5 }
 0xee0   : > { %p4637_p6 = pneg %p4636_p8 }
 0xee2   : > { %5114 = dma.done.wait (%p4637_p6), %s3954_s6, 128  }
 0xee3   : > { %5116 = vsyncadd (%p4637_p6), %s3954_s6, 4294967168  ;;  %s83_s18 = sadd.s32 1, %s5139_s18   ;;  %s5949_s4 = sld [smem:[#allocation41_spill]] }
 0xee4   : > { %p80_p10 = scmp.ge.s32.totalorder %s83_s18, 4   ;;  %s5950_s11 = sld [smem:[#allocation45_spill]] }
 0xee5   : > { %s5951_s15 = sld [smem:[#allocation42_spill]]  ;;  %s5953_s7 = smov %s5123_s10 }
 0xee6   : > { %s5952_s16 = sld [smem:[#allocation43_spill]]  ;;  %82 = sbr.rel (!%p80_p10) target bundleno = 70 (0x46), region = 259 }
 0xee9   : > { %s5954_s10 = smov %s5949_s4 }
 0xeeb   :  { %3959 = vsyncpa [#allocation3], 1 }
 0xeec   :  { %3961 = vsyncpa [#allocation3 + $0x1], 1 }
 0xeed   :  { %3962 = vsyncpa [#allocation6], 1 }
 0xeee   :  { %3963 = vsyncpa [#allocation9], 1 }
 0xeef   :  { %3964 = vsyncpa [#allocation4], 1 }
 0xef0   :  { %3966 = vsyncpa [#allocation4 + $0x1], 1 }

</bundles_post_ra>
